<compile_context>
chip_gen: v7x
topology: tpu7x:2x2x1
jax: 0.10.0
libtpu: 0.0.40
codegen_flags: <defaults>
</compile_context>

<pallas_src>
import math

import jax
import jax.numpy as jnp
from jax.experimental import pallas as pl
from jax.experimental.pallas import tpu as pltpu

ALPHA = math.sqrt(2.0 * math.pi)  # self.alpha = np.sqrt(np.pi * 2)


# --------------------------------------------------------------------------
# Parameters (synthetic stand-ins for the config-driven f / g / dn sub-nets)
# --------------------------------------------------------------------------

def init_params(channels, key):
    kf, kg, kdw, kdb = jax.random.split(key, 4)
    return {
        # weights_init: Conv2d weight ~ N(0, 0.02), bias = 0 (applied to f, g)
        "f_w": 0.02 * jax.random.normal(kf, (channels, channels, 3, 3), jnp.float32),
        "f_b": jnp.zeros((channels,), jnp.float32),
        "g_w": 0.02 * jax.random.normal(kg, (channels, channels, 3, 3), jnp.float32),
        "g_b": jnp.zeros((channels,), jnp.float32),
        # dn is not re-initialized in the original module; deterministic synthetic init.
        "dn_w": 0.1 * jax.random.normal(kdw, (channels, channels, 3, 3), jnp.float32),
        "dn_b": 0.01 * jax.random.normal(kdb, (channels,), jnp.float32),
    }


def _fuse_conv_weight(w, batch):
    """(Cout,Cin,3,3) -> (B*C, 9*B*C) tap-fused, block-diagonal-per-batch matrix."""
    c = w.shape[0]
    w_tap = jnp.transpose(w, (2, 3, 0, 1)).reshape(9, c, c).astype(jnp.float32)
    eye_b = jnp.eye(batch, dtype=jnp.float32)
    blocks = [jnp.kron(eye_b, w_tap[k]) for k in range(9)]   # each (B*C, B*C)
    return jnp.concatenate(blocks, axis=1)                   # (B*C, 9*B*C)


def _tile_bias(b, batch):
    return jnp.tile(b.astype(jnp.float32), batch).reshape(-1, 1)   # (B*C, 1)


# --------------------------------------------------------------------------
# Fused multi-stage forward (one pallas_call for all stages)
# --------------------------------------------------------------------------

def forward(x, params, key, stage=3):
    B, C, H, W = x.shape
    HW, BC = H * W, B * C

    xf = x.astype(jnp.float32).reshape(BC, HW)   # row = b*C + c, lane = h*W + w

    # tap-fused conv weights / biases for (dn, f, g), packed into single inputs
    w_all = jnp.stack([_fuse_conv_weight(params["dn_w"], B),
                       _fuse_conv_weight(params["f_w"], B),
                       _fuse_conv_weight(params["g_w"], B)], axis=0)   # (3, BC, 9BC)
    b_all = jnp.stack([_tile_bias(params["dn_b"], B),
                       _tile_bias(params["f_b"], B),
                       _tile_bias(params["g_b"], B)], axis=0)          # (3, BC, 1)

    # grid-invariant border masks for the 9 conv taps (tap k: dy=k//3-1, dx=k%3-1);
    # mask[1] (dy=-1,dx=0 i.e. h>=1) doubles as the nabla validity mask.
    hh = jnp.arange(HW, dtype=jnp.int32) // W
    ww = jnp.arange(HW, dtype=jnp.int32) % W
    masks = []
    for k in range(9):
        dy, dx = k // 3 - 1, k % 3 - 1
        m = (hh + dy >= 0) & (hh + dy < H) & (ww + dx >= 0) & (ww + dx < W)
        masks.append(m.astype(jnp.float32))
    masks = jnp.stack(masks, axis=0)                                    # (9, HW)

    # host-side RNG: randn noise slab + random_mix_up Bernoulli(0.5) mask per stage
    # (in-kernel pltpu PRNG has no interpret/CPU lowering; distribution-level parity
    #  with torch.randn_like only).
    kn, km = jax.random.split(key)
    noise = jax.random.normal(kn, (stage, BC, HW), jnp.float32)
    mix = (jax.random.normal(km, (stage, BC, HW), jnp.float32) > 0.0
           ).astype(jnp.float32)

    n_valid = float(B * C * (H - 1) * W)

    def stage_kernel(x_ref, m_ref, w_ref, b_ref, noise_ref, mix_ref,
                     out_ref, xc_ref):
        s = pl.program_id(0)

        # stage 0: load the stage-carried state from the input
        @pl.when(s == 0)
        def _():
            xc_ref[...] = x_ref[...]

        xcur = xc_ref[...]                       # (BC, HW) f32 — stage input x_in
        m_all = m_ref[...]                       # (9, HW) tap border masks

        def tap_stack(xv):
            """9 shifted+masked taps of xv; taps[k][r, p] = xv[r, p + dy*W + dx]."""
            taps = []
            for k in range(9):
                dy, dx = k // 3 - 1, k % 3 - 1
                off = dy * W + dx
                if off == 0:
                    taps.append(xv)
                else:
                    sh = pltpu.roll(xv, shift=(-off) % HW, axis=1)
                    taps.append(sh * m_all[k:k + 1, :])
            return taps

        def conv(taps, idx):
            """One fused MXU matmul: (BC, 9BC) @ (9BC, HW) + bias."""
            stack = jnp.concatenate(taps, axis=0)                  # (9*BC, HW)
            return (jnp.dot(w_ref[idx], stack,
                            preferred_element_type=jnp.float32) + b_ref[idx])

        # dn taps (tap 1 reused below for the noise-level nabla)
        taps0 = tap_stack(xcur)

        # --- get_noise_level: whole-batch scalar, exactly as in the reference ---
        m1 = m_all[1:2, :]                       # h >= 1
        nab = xcur * m1 - taps0[1]               # x[h]-x[h-1] at valid rows, else 0
        mean_nab = jnp.sum(nab) / n_valid
        dev = jnp.abs(nab - mean_nab) * m1
        delta = jnp.sum(dev) / n_valid
        val = jnp.abs(delta) * ALPHA
        # pow(val, 2/3) via exp/log, guarded against val == 0 (flat image)
        p23 = jnp.where(val > 0.0,
                        jnp.exp((2.0 / 3.0) * jnp.log(jnp.maximum(val, 1e-30))),
                        0.0)
        nl = jnp.sqrt(p23 * 0.5)                 # scalar noise level

        # x = dn(x); i = f(x); r = clamp(x / i); x = g(r)
        xdn = conv(taps0, 0)
        ill = jax.nn.sigmoid(conv(tap_stack(xdn), 1))
        r = jnp.clip(xdn / ill, 0.0, 1.0)
        xg = conv(tap_stack(r), 2)

        # x = randn*noise + g(r); random_mix_up(x_in, x): mask>0 -> x_in else x
        noisy = noise_ref[0] * nl + xg
        mix_m = mix_ref[0]
        xc_ref[...] = mix_m * xcur + (1.0 - mix_m) * noisy

        # single sublane-dense writeback: [inp | dnx | ill | res] stacked on rows
        out_ref[0] = jnp.concatenate([xcur, xdn, ill, r], axis=0)   # (4*BC, HW)

    grid_spec = pltpu.PrefetchScalarGridSpec(
        num_scalar_prefetch=0,
        grid=(stage,),
        in_specs=[
            pl.BlockSpec((BC, HW), lambda s: (0, 0)),              # x0 (resident)
            pl.BlockSpec((9, HW), lambda s: (0, 0)),               # tap masks
            pl.BlockSpec((3, BC, 9 * BC), lambda s: (0, 0, 0)),    # fused weights
            pl.BlockSpec((3, BC, 1), lambda s: (0, 0, 0)),         # biases
            pl.BlockSpec((1, BC, HW), lambda s: (s, 0, 0)),        # per-stage noise
            pl.BlockSpec((1, BC, HW), lambda s: (s, 0, 0)),        # per-stage mix mask
        ],
        out_specs=pl.BlockSpec((1, 4 * BC, HW), lambda s: (s, 0, 0)),
        scratch_shapes=[pltpu.VMEM((BC, HW), jnp.float32)],        # stage-carried x
    )

    out = pl.pallas_call(
        stage_kernel,
        out_shape=jax.ShapeDtypeStruct((stage, 4 * BC, HW), jnp.float32),
        grid_spec=grid_spec,
        compiler_params=pltpu.CompilerParams(
            dimension_semantics=("arbitrary",)),                   # sequential carry
    )(xf, masks, w_all, b_all, noise, mix)

    def split(j):
        a = out[:, j * BC:(j + 1) * BC, :].reshape(stage, B, C, H, W)
        return [a[i] for i in range(stage)]

    inp_l = split(0)
    # inlist and nlist hold the same tensors in the PyTorch reference.
    return dict(inp=inp_l, res=split(3), ill=split(2), nx=inp_l, dnx=split(1))


# --------------------------------------------------------------------------

if __name__ == "__main__":
    key = jax.random.PRNGKey(0)
    k_x, k_p, k_r = jax.random.split(key, 3)

    B, C, H, W = 2, 4, 16, 16
    STAGE = 3

    x = jax.random.uniform(k_x, (B, C, H, W), jnp.float32,
                           minval=0.05, maxval=1.0)
    params = init_params(C, k_p)

    fwd = jax.jit(forward, static_argnames=("stage",))
    out = fwd(x, params, k_r, stage=STAGE)
    jax.block_until_ready(out)

    # light sanity checks
    assert len(out["res"]) == STAGE and out["res"][0].shape == (B, C, H, W)
    assert len(out["dnx"]) == STAGE and out["ill"][0].shape == (B, C, H, W)
    assert bool(jnp.allclose(out["inp"][0], x, atol=1e-6))   # stage-0 input is x
    assert bool(jnp.all(jnp.isfinite(out["res"][0])))
    assert bool(jnp.all(out["res"][0] >= 0.0)) and bool(jnp.all(out["res"][0] <= 1.0))

    print("KERNEL_OK")
</pallas_src>

<mosaic_0001>
module attributes {stable_mosaic.version = 11 : i64} {
  func.func @stage_kernel(%arg0: i32, %arg1: memref<8x256xf32, #tpu.memory_space<vmem>>, %arg2: memref<9x256xf32, #tpu.memory_space<vmem>>, %arg3: memref<3x8x72xf32, #tpu.memory_space<vmem>>, %arg4: memref<3x8x1xf32, #tpu.memory_space<vmem>>, %arg5: memref<1x8x256xf32, #tpu.memory_space<vmem>>, %arg6: memref<1x8x256xf32, #tpu.memory_space<vmem>>, %arg7: memref<1x32x256xf32, #tpu.memory_space<vmem>>, %arg8: memref<8x256xf32, #tpu.memory_space<vmem>>) attributes {dimension_semantics = [#tpu.dimension_semantics<arbitrary>], iteration_bounds = array<i64: 3>, scalar_prefetch = 0 : i64, scratch_operands = 1 : i64, tpu.core_type = #tpu.core_type<tc>, window_params = [{pipeline_mode = #tpu.pipeline_mode<synchronous>, transform_indices = @transform_0, window_bounds = array<i64: 8, 256>}, {pipeline_mode = #tpu.pipeline_mode<synchronous>, transform_indices = @transform_1, window_bounds = array<i64: 9, 256>}, {pipeline_mode = #tpu.pipeline_mode<synchronous>, transform_indices = @transform_2, window_bounds = array<i64: 3, 8, 72>}, {pipeline_mode = #tpu.pipeline_mode<synchronous>, transform_indices = @transform_3, window_bounds = array<i64: 3, 8, 1>}, {transform_indices = @transform_4, window_bounds = array<i64: 1, 8, 256>}, {transform_indices = @transform_5, window_bounds = array<i64: 1, 8, 256>}, {transform_indices = @transform_6, window_bounds = array<i64: 1, 32, 256>}]} {
    %c0_i32 = arith.constant 0 : i32
    %0 = arith.cmpi eq, %arg0, %c0_i32 : i32
    %1 = arith.extui %0 : i1 to i32
    %c0_i32_0 = arith.constant 0 : i32
    %2 = arith.cmpi ne, %1, %c0_i32_0 : i32
    scf.if %2 {
      %c0_63 = arith.constant 0 : index
      %c0_64 = arith.constant 0 : index
      %181 = vector.load %arg1[%c0_63, %c0_64] : memref<8x256xf32, #tpu.memory_space<vmem>>, vector<8x256xf32>
      %c0_65 = arith.constant 0 : index
      %c0_66 = arith.constant 0 : index
      %182 = vector.load %arg8[%c0_65, %c0_66] : memref<8x256xf32, #tpu.memory_space<vmem>>, vector<8x256xf32>
      tpu.vector_store %arg8[%c0_65, %c0_66], %181 {strides = array<i32>} : memref<8x256xf32, #tpu.memory_space<vmem>>, vector<8x256xf32>,
    } else {
    }
    %c0 = arith.constant 0 : index
    %c0_1 = arith.constant 0 : index
    %3 = vector.load %arg8[%c0, %c0_1] : memref<8x256xf32, #tpu.memory_space<vmem>>, vector<8x256xf32>
    %c0_2 = arith.constant 0 : index
    %c0_3 = arith.constant 0 : index
    %4 = vector.load %arg2[%c0_2, %c0_3] : memref<9x256xf32, #tpu.memory_space<vmem>>, vector<9x256xf32>
    %c17_i32 = arith.constant 17 : i32
    %5 = tpu.dynamic_rotate %3 by %c17_i32 dim 1 : vector<8x256xf32>, i32 -> vector<8x256xf32>
    %6 = vector.extract_strided_slice %4 {offsets = [0, 0], sizes = [1, 256], strides = [1, 1]} : vector<9x256xf32> to vector<1x256xf32>
    %7 = vector.broadcast %6 : vector<1x256xf32> to vector<8x256xf32>
    %8 = arith.mulf %5, %7 : vector<8x256xf32>
    %c16_i32 = arith.constant 16 : i32
    %9 = tpu.dynamic_rotate %3 by %c16_i32 dim 1 : vector<8x256xf32>, i32 -> vector<8x256xf32>
    %10 = vector.extract_strided_slice %4 {offsets = [1, 0], sizes = [1, 256], strides = [1, 1]} : vector<9x256xf32> to vector<1x256xf32>
    %11 = vector.broadcast %10 : vector<1x256xf32> to vector<8x256xf32>
    %12 = arith.mulf %9, %11 : vector<8x256xf32>
    %c15_i32 = arith.constant 15 : i32
    %13 = tpu.dynamic_rotate %3 by %c15_i32 dim 1 : vector<8x256xf32>, i32 -> vector<8x256xf32>
    %14 = vector.extract_strided_slice %4 {offsets = [2, 0], sizes = [1, 256], strides = [1, 1]} : vector<9x256xf32> to vector<1x256xf32>
    %15 = vector.broadcast %14 : vector<1x256xf32> to vector<8x256xf32>
    %16 = arith.mulf %13, %15 : vector<8x256xf32>
    %c1_i32 = arith.constant 1 : i32
    %17 = tpu.dynamic_rotate %3 by %c1_i32 dim 1 : vector<8x256xf32>, i32 -> vector<8x256xf32>
    %18 = vector.extract_strided_slice %4 {offsets = [3, 0], sizes = [1, 256], strides = [1, 1]} : vector<9x256xf32> to vector<1x256xf32>
    %19 = vector.broadcast %18 : vector<1x256xf32> to vector<8x256xf32>
    %20 = arith.mulf %17, %19 : vector<8x256xf32>
    %c255_i32 = arith.constant 255 : i32
    %21 = tpu.dynamic_rotate %3 by %c255_i32 dim 1 : vector<8x256xf32>, i32 -> vector<8x256xf32>
    %22 = vector.extract_strided_slice %4 {offsets = [5, 0], sizes = [1, 256], strides = [1, 1]} : vector<9x256xf32> to vector<1x256xf32>
    %23 = vector.broadcast %22 : vector<1x256xf32> to vector<8x256xf32>
    %24 = arith.mulf %21, %23 : vector<8x256xf32>
    %c241_i32 = arith.constant 241 : i32
    %25 = tpu.dynamic_rotate %3 by %c241_i32 dim 1 : vector<8x256xf32>, i32 -> vector<8x256xf32>
    %26 = vector.extract_strided_slice %4 {offsets = [6, 0], sizes = [1, 256], strides = [1, 1]} : vector<9x256xf32> to vector<1x256xf32>
    %27 = vector.broadcast %26 : vector<1x256xf32> to vector<8x256xf32>
    %28 = arith.mulf %25, %27 : vector<8x256xf32>
    %c240_i32 = arith.constant 240 : i32
    %29 = tpu.dynamic_rotate %3 by %c240_i32 dim 1 : vector<8x256xf32>, i32 -> vector<8x256xf32>
    %30 = vector.extract_strided_slice %4 {offsets = [7, 0], sizes = [1, 256], strides = [1, 1]} : vector<9x256xf32> to vector<1x256xf32>
    %31 = vector.broadcast %30 : vector<1x256xf32> to vector<8x256xf32>
    %32 = arith.mulf %29, %31 : vector<8x256xf32>
    %c239_i32 = arith.constant 239 : i32
    %33 = tpu.dynamic_rotate %3 by %c239_i32 dim 1 : vector<8x256xf32>, i32 -> vector<8x256xf32>
    %34 = vector.extract_strided_slice %4 {offsets = [8, 0], sizes = [1, 256], strides = [1, 1]} : vector<9x256xf32> to vector<1x256xf32>
    %35 = vector.broadcast %34 : vector<1x256xf32> to vector<8x256xf32>
    %36 = arith.mulf %33, %35 : vector<8x256xf32>
    %37 = vector.extract_strided_slice %4 {offsets = [1, 0], sizes = [1, 256], strides = [1, 1]} : vector<9x256xf32> to vector<1x256xf32>
    %38 = vector.broadcast %37 : vector<1x256xf32> to vector<8x256xf32>
    %39 = arith.mulf %3, %38 : vector<8x256xf32>
    %40 = arith.subf %39, %12 : vector<8x256xf32>
    %41 = vector.shape_cast %40 : vector<8x256xf32> to vector<1x8x256xf32>
    %cst = arith.constant dense<0.000000e+00> : vector<1xf32>
    %42 = vector.multi_reduction <add>, %41, %cst [1, 2] : vector<1x8x256xf32> to vector<1xf32>
    %43 = vector.shape_cast %42 : vector<1xf32> to vector<1x1x1xf32>
    %44 = vector.extract %43[0, 0, 0] : f32 from vector<1x1x1xf32>
    %cst_4 = arith.constant 1.920000e+03 : f32
    %45 = arith.divf %44, %cst_4 : f32
    %46 = vector.broadcast %45 : f32 to vector<8x256xf32>
    %47 = arith.subf %40, %46 : vector<8x256xf32>
    %48 = math.absf %47 : vector<8x256xf32>
    %49 = vector.broadcast %37 : vector<1x256xf32> to vector<8x256xf32>
    %50 = arith.mulf %48, %49 : vector<8x256xf32>
    %51 = vector.shape_cast %50 : vector<8x256xf32> to vector<1x8x256xf32>
    %cst_5 = arith.constant dense<0.000000e+00> : vector<1xf32>
    %52 = vector.multi_reduction <add>, %51, %cst_5 [1, 2] : vector<1x8x256xf32> to vector<1xf32>
    %53 = vector.shape_cast %52 : vector<1xf32> to vector<1x1x1xf32>
    %54 = vector.extract %53[0, 0, 0] : f32 from vector<1x1x1xf32>
    %cst_6 = arith.constant 1.920000e+03 : f32
    %55 = arith.divf %54, %cst_6 : f32
    %56 = math.absf %55 : f32
    %cst_7 = arith.constant 2.50662827 : f32
    %57 = arith.mulf %56, %cst_7 : f32
    %cst_8 = arith.constant 0.000000e+00 : f32
    %58 = arith.cmpf ogt, %57, %cst_8 : f32
    %cst_9 = arith.constant 1.000000e-30 : f32
    %59 = arith.maximumf %57, %cst_9 : f32
    %60 = math.log %59 : f32
    %cst_10 = arith.constant 0.666666686 : f32
    %61 = arith.mulf %cst_10, %60 : f32
    %62 = math.exp %61 : f32
    %cst_11 = arith.constant 0.000000e+00 : f32
    %63 = arith.select %58, %62, %cst_11 : f32
    %cst_12 = arith.constant 5.000000e-01 : f32
    %64 = arith.mulf %63, %cst_12 : f32
    %65 = math.sqrt %64 : f32
    %66 = tpu.concatenate %8, %12, %16, %20, %3, %24, %28, %32, %36 in 0 : vector<8x256xf32>, vector<8x256xf32>, vector<8x256xf32>, vector<8x256xf32>, vector<8x256xf32>, vector<8x256xf32>, vector<8x256xf32>, vector<8x256xf32>, vector<8x256xf32> -> vector<72x256xf32>
    %c0_13 = arith.constant 0 : index
    %c0_14 = arith.constant 0 : index
    %c0_15 = arith.constant 0 : index
    %67 = vector.load %arg3[%c0_13, %c0_14, %c0_15] : memref<3x8x72xf32, #tpu.memory_space<vmem>>, vector<1x8x72xf32>
    %68 = vector.shape_cast %67 : vector<1x8x72xf32> to vector<8x72xf32>
    %cst_16 = arith.constant dense<0.000000e+00> : vector<8x256xf32>
    %69 = tpu.matmul %68, %66, %cst_16 {dimension_numbers = #tpu.dot_dimension_numbers<[1], [0], [0], [1], [0, 0, 1, 1], [], []>} : vector<8x72xf32>, vector<72x256xf32>, vector<8x256xf32> -> vector<8x256xf32>
    %c0_17 = arith.constant 0 : index
    %c0_18 = arith.constant 0 : index
    %c0_19 = arith.constant 0 : index
    %70 = vector.load %arg4[%c0_17, %c0_18, %c0_19] : memref<3x8x1xf32, #tpu.memory_space<vmem>>, vector<1x8x1xf32>
    %71 = vector.shape_cast %70 : vector<1x8x1xf32> to vector<8x1xf32>
    %72 = vector.broadcast %71 : vector<8x1xf32> to vector<8x256xf32>
    %73 = arith.addf %69, %72 : vector<8x256xf32>
    %c17_i32_20 = arith.constant 17 : i32
    %74 = tpu.dynamic_rotate %73 by %c17_i32_20 dim 1 : vector<8x256xf32>, i32 -> vector<8x256xf32>
    %75 = vector.extract_strided_slice %4 {offsets = [0, 0], sizes = [1, 256], strides = [1, 1]} : vector<9x256xf32> to vector<1x256xf32>
    %76 = vector.broadcast %75 : vector<1x256xf32> to vector<8x256xf32>
    %77 = arith.mulf %74, %76 : vector<8x256xf32>
    %c16_i32_21 = arith.constant 16 : i32
    %78 = tpu.dynamic_rotate %73 by %c16_i32_21 dim 1 : vector<8x256xf32>, i32 -> vector<8x256xf32>
    %79 = vector.extract_strided_slice %4 {offsets = [1, 0], sizes = [1, 256], strides = [1, 1]} : vector<9x256xf32> to vector<1x256xf32>
    %80 = vector.broadcast %79 : vector<1x256xf32> to vector<8x256xf32>
    %81 = arith.mulf %78, %80 : vector<8x256xf32>
    %c15_i32_22 = arith.constant 15 : i32
    %82 = tpu.dynamic_rotate %73 by %c15_i32_22 dim 1 : vector<8x256xf32>, i32 -> vector<8x256xf32>
    %83 = vector.extract_strided_slice %4 {offsets = [2, 0], sizes = [1, 256], strides = [1, 1]} : vector<9x256xf32> to vector<1x256xf32>
    %84 = vector.broadcast %83 : vector<1x256xf32> to vector<8x256xf32>
    %85 = arith.mulf %82, %84 : vector<8x256xf32>
    %c1_i32_23 = arith.constant 1 : i32
    %86 = tpu.dynamic_rotate %73 by %c1_i32_23 dim 1 : vector<8x256xf32>, i32 -> vector<8x256xf32>
    %87 = vector.extract_strided_slice %4 {offsets = [3, 0], sizes = [1, 256], strides = [1, 1]} : vector<9x256xf32> to vector<1x256xf32>
    %88 = vector.broadcast %87 : vector<1x256xf32> to vector<8x256xf32>
    %89 = arith.mulf %86, %88 : vector<8x256xf32>
    %c255_i32_24 = arith.constant 255 : i32
    %90 = tpu.dynamic_rotate %73 by %c255_i32_24 dim 1 : vector<8x256xf32>, i32 -> vector<8x256xf32>
    %91 = vector.extract_strided_slice %4 {offsets = [5, 0], sizes = [1, 256], strides = [1, 1]} : vector<9x256xf32> to vector<1x256xf32>
    %92 = vector.broadcast %91 : vector<1x256xf32> to vector<8x256xf32>
    %93 = arith.mulf %90, %92 : vector<8x256xf32>
    %c241_i32_25 = arith.constant 241 : i32
    %94 = tpu.dynamic_rotate %73 by %c241_i32_25 dim 1 : vector<8x256xf32>, i32 -> vector<8x256xf32>
    %95 = vector.extract_strided_slice %4 {offsets = [6, 0], sizes = [1, 256], strides = [1, 1]} : vector<9x256xf32> to vector<1x256xf32>
    %96 = vector.broadcast %95 : vector<1x256xf32> to vector<8x256xf32>
    %97 = arith.mulf %94, %96 : vector<8x256xf32>
    %c240_i32_26 = arith.constant 240 : i32
    %98 = tpu.dynamic_rotate %73 by %c240_i32_26 dim 1 : vector<8x256xf32>, i32 -> vector<8x256xf32>
    %99 = vector.extract_strided_slice %4 {offsets = [7, 0], sizes = [1, 256], strides = [1, 1]} : vector<9x256xf32> to vector<1x256xf32>
    %100 = vector.broadcast %99 : vector<1x256xf32> to vector<8x256xf32>
    %101 = arith.mulf %98, %100 : vector<8x256xf32>
    %c239_i32_27 = arith.constant 239 : i32
    %102 = tpu.dynamic_rotate %73 by %c239_i32_27 dim 1 : vector<8x256xf32>, i32 -> vector<8x256xf32>
    %103 = vector.extract_strided_slice %4 {offsets = [8, 0], sizes = [1, 256], strides = [1, 1]} : vector<9x256xf32> to vector<1x256xf32>
    %104 = vector.broadcast %103 : vector<1x256xf32> to vector<8x256xf32>
    %105 = arith.mulf %102, %104 : vector<8x256xf32>
    %106 = tpu.concatenate %77, %81, %85, %89, %73, %93, %97, %101, %105 in 0 : vector<8x256xf32>, vector<8x256xf32>, vector<8x256xf32>, vector<8x256xf32>, vector<8x256xf32>, vector<8x256xf32>, vector<8x256xf32>, vector<8x256xf32>, vector<8x256xf32> -> vector<72x256xf32>
    %c1 = arith.constant 1 : index
    %c0_28 = arith.constant 0 : index
    %c0_29 = arith.constant 0 : index
    %107 = vector.load %arg3[%c1, %c0_28, %c0_29] : memref<3x8x72xf32, #tpu.memory_space<vmem>>, vector<1x8x72xf32>
    %108 = vector.shape_cast %107 : vector<1x8x72xf32> to vector<8x72xf32>
    %cst_30 = arith.constant dense<0.000000e+00> : vector<8x256xf32>
    %109 = tpu.matmul %108, %106, %cst_30 {dimension_numbers = #tpu.dot_dimension_numbers<[1], [0], [0], [1], [0, 0, 1, 1], [], []>} : vector<8x72xf32>, vector<72x256xf32>, vector<8x256xf32> -> vector<8x256xf32>
    %c1_31 = arith.constant 1 : index
    %c0_32 = arith.constant 0 : index
    %c0_33 = arith.constant 0 : index
    %110 = vector.load %arg4[%c1_31, %c0_32, %c0_33] : memref<3x8x1xf32, #tpu.memory_space<vmem>>, vector<1x8x1xf32>
    %111 = vector.shape_cast %110 : vector<1x8x1xf32> to vector<8x1xf32>
    %112 = vector.broadcast %111 : vector<8x1xf32> to vector<8x256xf32>
    %113 = arith.addf %109, %112 : vector<8x256xf32>
    %114 = arith.negf %113 : vector<8x256xf32>
    %115 = math.exp %114 : vector<8x256xf32>
    %cst_34 = arith.constant 1.000000e+00 : f32
    %116 = vector.broadcast %cst_34 : f32 to vector<8x256xf32>
    %117 = arith.addf %116, %115 : vector<8x256xf32>
    %118 = arith.divf %116, %117 : vector<8x256xf32>
    %119 = arith.divf %73, %118 : vector<8x256xf32>
    %cst_35 = arith.constant 0.000000e+00 : f32
    %cst_36 = arith.constant 1.000000e+00 : f32
    %120 = vector.broadcast %cst_35 : f32 to vector<8x256xf32>
    %121 = arith.maximumf %120, %119 : vector<8x256xf32>
    %122 = vector.broadcast %cst_36 : f32 to vector<8x256xf32>
    %123 = arith.minimumf %122, %121 : vector<8x256xf32>
    %c17_i32_37 = arith.constant 17 : i32
    %124 = tpu.dynamic_rotate %123 by %c17_i32_37 dim 1 : vector<8x256xf32>, i32 -> vector<8x256xf32>
    %125 = vector.extract_strided_slice %4 {offsets = [0, 0], sizes = [1, 256], strides = [1, 1]} : vector<9x256xf32> to vector<1x256xf32>
    %126 = vector.broadcast %125 : vector<1x256xf32> to vector<8x256xf32>
    %127 = arith.mulf %124, %126 : vector<8x256xf32>
    %c16_i32_38 = arith.constant 16 : i32
    %128 = tpu.dynamic_rotate %123 by %c16_i32_38 dim 1 : vector<8x256xf32>, i32 -> vector<8x256xf32>
    %129 = vector.extract_strided_slice %4 {offsets = [1, 0], sizes = [1, 256], strides = [1, 1]} : vector<9x256xf32> to vector<1x256xf32>
    %130 = vector.broadcast %129 : vector<1x256xf32> to vector<8x256xf32>
    %131 = arith.mulf %128, %130 : vector<8x256xf32>
    %c15_i32_39 = arith.constant 15 : i32
    %132 = tpu.dynamic_rotate %123 by %c15_i32_39 dim 1 : vector<8x256xf32>, i32 -> vector<8x256xf32>
    %133 = vector.extract_strided_slice %4 {offsets = [2, 0], sizes = [1, 256], strides = [1, 1]} : vector<9x256xf32> to vector<1x256xf32>
    %134 = vector.broadcast %133 : vector<1x256xf32> to vector<8x256xf32>
    %135 = arith.mulf %132, %134 : vector<8x256xf32>
    %c1_i32_40 = arith.constant 1 : i32
    %136 = tpu.dynamic_rotate %123 by %c1_i32_40 dim 1 : vector<8x256xf32>, i32 -> vector<8x256xf32>
    %137 = vector.extract_strided_slice %4 {offsets = [3, 0], sizes = [1, 256], strides = [1, 1]} : vector<9x256xf32> to vector<1x256xf32>
    %138 = vector.broadcast %137 : vector<1x256xf32> to vector<8x256xf32>
    %139 = arith.mulf %136, %138 : vector<8x256xf32>
    %c255_i32_41 = arith.constant 255 : i32
    %140 = tpu.dynamic_rotate %123 by %c255_i32_41 dim 1 : vector<8x256xf32>, i32 -> vector<8x256xf32>
    %141 = vector.extract_strided_slice %4 {offsets = [5, 0], sizes = [1, 256], strides = [1, 1]} : vector<9x256xf32> to vector<1x256xf32>
    %142 = vector.broadcast %141 : vector<1x256xf32> to vector<8x256xf32>
    %143 = arith.mulf %140, %142 : vector<8x256xf32>
    %c241_i32_42 = arith.constant 241 : i32
    %144 = tpu.dynamic_rotate %123 by %c241_i32_42 dim 1 : vector<8x256xf32>, i32 -> vector<8x256xf32>
    %145 = vector.extract_strided_slice %4 {offsets = [6, 0], sizes = [1, 256], strides = [1, 1]} : vector<9x256xf32> to vector<1x256xf32>
    %146 = vector.broadcast %145 : vector<1x256xf32> to vector<8x256xf32>
    %147 = arith.mulf %144, %146 : vector<8x256xf32>
    %c240_i32_43 = arith.constant 240 : i32
    %148 = tpu.dynamic_rotate %123 by %c240_i32_43 dim 1 : vector<8x256xf32>, i32 -> vector<8x256xf32>
    %149 = vector.extract_strided_slice %4 {offsets = [7, 0], sizes = [1, 256], strides = [1, 1]} : vector<9x256xf32> to vector<1x256xf32>
    %150 = vector.broadcast %149 : vector<1x256xf32> to vector<8x256xf32>
    %151 = arith.mulf %148, %150 : vector<8x256xf32>
    %c239_i32_44 = arith.constant 239 : i32
    %152 = tpu.dynamic_rotate %123 by %c239_i32_44 dim 1 : vector<8x256xf32>, i32 -> vector<8x256xf32>
    %153 = vector.extract_strided_slice %4 {offsets = [8, 0], sizes = [1, 256], strides = [1, 1]} : vector<9x256xf32> to vector<1x256xf32>
    %154 = vector.broadcast %153 : vector<1x256xf32> to vector<8x256xf32>
    %155 = arith.mulf %152, %154 : vector<8x256xf32>
    %156 = tpu.concatenate %127, %131, %135, %139, %123, %143, %147, %151, %155 in 0 : vector<8x256xf32>, vector<8x256xf32>, vector<8x256xf32>, vector<8x256xf32>, vector<8x256xf32>, vector<8x256xf32>, vector<8x256xf32>, vector<8x256xf32>, vector<8x256xf32> -> vector<72x256xf32>
    %c2 = arith.constant 2 : index
    %c0_45 = arith.constant 0 : index
    %c0_46 = arith.constant 0 : index
    %157 = vector.load %arg3[%c2, %c0_45, %c0_46] : memref<3x8x72xf32, #tpu.memory_space<vmem>>, vector<1x8x72xf32>
    %158 = vector.shape_cast %157 : vector<1x8x72xf32> to vector<8x72xf32>
    %cst_47 = arith.constant dense<0.000000e+00> : vector<8x256xf32>
    %159 = tpu.matmul %158, %156, %cst_47 {dimension_numbers = #tpu.dot_dimension_numbers<[1], [0], [0], [1], [0, 0, 1, 1], [], []>} : vector<8x72xf32>, vector<72x256xf32>, vector<8x256xf32> -> vector<8x256xf32>
    %c2_48 = arith.constant 2 : index
    %c0_49 = arith.constant 0 : index
    %c0_50 = arith.constant 0 : index
    %160 = vector.load %arg4[%c2_48, %c0_49, %c0_50] : memref<3x8x1xf32, #tpu.memory_space<vmem>>, vector<1x8x1xf32>
    %161 = vector.shape_cast %160 : vector<1x8x1xf32> to vector<8x1xf32>
    %162 = vector.broadcast %161 : vector<8x1xf32> to vector<8x256xf32>
    %163 = arith.addf %159, %162 : vector<8x256xf32>
    %c0_51 = arith.constant 0 : index
    %c0_52 = arith.constant 0 : index
    %c0_53 = arith.constant 0 : index
    %164 = vector.load %arg5[%c0_51, %c0_52, %c0_53] : memref<1x8x256xf32, #tpu.memory_space<vmem>>, vector<1x8x256xf32>
    %165 = vector.shape_cast %164 : vector<1x8x256xf32> to vector<8x256xf32>
    %166 = vector.broadcast %65 : f32 to vector<8x256xf32>
    %167 = arith.mulf %165, %166 : vector<8x256xf32>
    %168 = arith.addf %167, %163 : vector<8x256xf32>
    %c0_54 = arith.constant 0 : index
    %c0_55 = arith.constant 0 : index
    %c0_56 = arith.constant 0 : index
    %169 = vector.load %arg6[%c0_54, %c0_55, %c0_56] : memref<1x8x256xf32, #tpu.memory_space<vmem>>, vector<1x8x256xf32>
    %170 = vector.shape_cast %169 : vector<1x8x256xf32> to vector<8x256xf32>
    %171 = arith.mulf %170, %3 : vector<8x256xf32>
    %cst_57 = arith.constant 1.000000e+00 : f32
    %172 = vector.broadcast %cst_57 : f32 to vector<8x256xf32>
    %173 = arith.subf %172, %170 : vector<8x256xf32>
    %174 = arith.mulf %173, %168 : vector<8x256xf32>
    %175 = arith.addf %171, %174 : vector<8x256xf32>
    %c0_58 = arith.constant 0 : index
    %c0_59 = arith.constant 0 : index
    %176 = vector.load %arg8[%c0_58, %c0_59] : memref<8x256xf32, #tpu.memory_space<vmem>>, vector<8x256xf32>
    tpu.vector_store %arg8[%c0_58, %c0_59], %175 {strides = array<i32>} : memref<8x256xf32, #tpu.memory_space<vmem>>, vector<8x256xf32>,
    %177 = tpu.concatenate %3, %73, %118, %123 in 0 : vector<8x256xf32>, vector<8x256xf32>, vector<8x256xf32>, vector<8x256xf32> -> vector<32x256xf32>
    %c0_60 = arith.constant 0 : index
    %c0_61 = arith.constant 0 : index
    %c0_62 = arith.constant 0 : index
    %178 = vector.load %arg7[%c0_60, %c0_61, %c0_62] : memref<1x32x256xf32, #tpu.memory_space<vmem>>, vector<1x32x256xf32>
    %179 = vector.shape_cast %178 : vector<1x32x256xf32> to vector<32x256xf32>
    %180 = vector.shape_cast %177 : vector<32x256xf32> to vector<1x32x256xf32>
    tpu.vector_store %arg7[%c0_60, %c0_61, %c0_62], %180 {strides = array<i32>} : memref<1x32x256xf32, #tpu.memory_space<vmem>>, vector<1x32x256xf32>,
    return
  }
  func.func @transform_0(%arg0: i32) -> (i32, i32) {
    %c0_i32 = arith.constant 0 : i32
    %c0_i32_0 = arith.constant 0 : i32
    %c0_i32_1 = arith.constant 0 : i32
    return %c0_i32, %c0_i32_0 : i32, i32
  }
  func.func @transform_1(%arg0: i32) -> (i32, i32) {
    %c0_i32 = arith.constant 0 : i32
    %c0_i32_0 = arith.constant 0 : i32
    %c0_i32_1 = arith.constant 0 : i32
    return %c0_i32, %c0_i32_0 : i32, i32
  }
  func.func @transform_2(%arg0: i32) -> (i32, i32, i32) {
    %c0_i32 = arith.constant 0 : i32
    %c0_i32_0 = arith.constant 0 : i32
    %c0_i32_1 = arith.constant 0 : i32
    %c0_i32_2 = arith.constant 0 : i32
    return %c0_i32, %c0_i32_0, %c0_i32_1 : i32, i32, i32
  }
  func.func @transform_3(%arg0: i32) -> (i32, i32, i32) {
    %c0_i32 = arith.constant 0 : i32
    %c0_i32_0 = arith.constant 0 : i32
    %c0_i32_1 = arith.constant 0 : i32
    %c0_i32_2 = arith.constant 0 : i32
    return %c0_i32, %c0_i32_0, %c0_i32_1 : i32, i32, i32
  }
  func.func @transform_4(%arg0: i32) -> (i32, i32, i32) {
    %c0_i32 = arith.constant 0 : i32
    %c0_i32_0 = arith.constant 0 : i32
    %c0_i32_1 = arith.constant 0 : i32
    return %arg0, %c0_i32, %c0_i32_0 : i32, i32, i32
  }
  func.func @transform_5(%arg0: i32) -> (i32, i32, i32) {
    %c0_i32 = arith.constant 0 : i32
    %c0_i32_0 = arith.constant 0 : i32
    %c0_i32_1 = arith.constant 0 : i32
    return %arg0, %c0_i32, %c0_i32_0 : i32, i32, i32
  }
  func.func @transform_6(%arg0: i32) -> (i32, i32, i32) {
    %c0_i32 = arith.constant 0 : i32
    %c0_i32_0 = arith.constant 0 : i32
    %c0_i32_1 = arith.constant 0 : i32
    return %arg0, %c0_i32, %c0_i32_0 : i32, i32, i32
  }
}

</mosaic_0001>

<bundles_post_ra>
// kernel: tile.18
= control target key start
LH: loop header
LB: loop body
LE: loop exit
PB: predicated region body
PF: predicated region fallthrough
CT: control target
= control target key end

     0   :  { %s22_s0 = inlined_call_operand.vmem [shape: f32[4], index: 0, kind: input, shape index: {}]   ;;  %s23_s1 = inlined_call_operand.vmem [shape: f32[2,4], index: 1, kind: output, shape index: {}]  }
   0x1   :  { %v4_v0 = vld [vmem:[%s22_s0] ss:$0 sm:$0xff] }
   0x2   :  { %5 = vst [vmem:[%s23_s1] sm:$0x3] %v4_v0 }

// kernel: tile.27
= control target key start
LH: loop header
LB: loop body
LE: loop exit
PB: predicated region body
PF: predicated region fallthrough
CT: control target
= control target key end

     0   :  { %vm7_vm0 = vcmask 31744   ;;  %vm13_vm1 = vcmask 64544   ;;  %s39_s0 = inlined_call_operand.vmem [shape: f32[2,4], index: 0, kind: input, shape index: {}]   ;;  %s40_s1 = inlined_call_operand.vmem [shape: f32[1,8,1], index: 1, kind: output, shape index: {}]  }
   0x1   :  { %v4_v0 = vld [vmem:[%s39_s0] sm:$0x3]  ;;  %s22_s0 = smov 4  }
   0x2   :  { %5 = vst [vmem:[#allocation1] sm:$0x3] %v4_v0 }
   0x9   :  { %v10_v1 = vld [vmem:[#allocation1 + $0x1] sm:$0x1]   ;;  %v6_v2 = vld [vmem:[#allocation1] sm:$0x1]  }
   0xa   :  { %11 = vrot.lane.b32.xlu0 %v10_v1, %s22_s0  ;;  %8 = vst.msk [vmem:[#allocation0] sm:$0x1] %vm7_vm0, %v6_v2  }
  0x7c   :  { %v12_v3 = vpop.permute.xlu0 %11  }
  0x7d   :  { %14 = vst.msk [vmem:[#allocation0] sm:$0x1] %vm13_vm1, %v12_v3  }
  0x84   :  { %v18_v4 = vld [vmem:[#allocation0] sm:$0x1] }
  0x85   :  { %20 = vst [vmem:[%s40_s1] sm:$0x1] %v18_v4 }

// kernel: squeeze.78
= control target key start
LH: loop header
LB: loop body
LE: loop exit
PB: predicated region body
PF: predicated region fallthrough
CT: control target
= control target key end

     0   :  { %s185_s8 = smov 96   ;;  %s186_s9 = smov 112   ;;  %vm3_vm0 = vcmask 130048   ;;  %s358_s0 = inlined_call_operand.vmem [shape: f32[1,8,256], index: 0, kind: input, shape index: {}]   ;;  %s359_s1 = inlined_call_operand.vmem [shape: f32[2,4,16,16], index: 1, kind: output, shape index: {}]  }
   0x1   :  { %v36_v0 = vld.sshfl [vmem:[%s358_s0] sm:$0xff pattern:$0xb3a29180]   ;;  %v150_v1 = vld.sshfl [vmem:[%s358_s0 + $0x4] sm:$0xff pattern:$0xb3a29180]  }
   0x2   :  { %37 = vrot.lane.b32.xlu1 %v36_v0, %s185_s8  ;;  %20 = vrot.lane.b32.xlu0 %v36_v0, %s186_s9  ;;  %s187_s12 = smov 80   ;;  %v2_v2 = vld [vmem:[%s358_s0] sm:$0xff]   ;;  %v138_v3 = vld [vmem:[%s358_s0 + $0x8] sm:$0xff]   ;;  %s188_s3 = smov 64  }
   0x3   :  { %4 = vst.msk [vmem:[%s359_s1] ss:$16 sm:$0x3] %vm3_vm0, %v2_v2   ;;  %5 = vst.msk [vmem:[%s359_s1] ss:$16 sm:$0xc] %vm3_vm0, %v2_v2  }
   0x4   :  { %6 = vst.msk [vmem:[%s359_s1] ss:$16 sm:$0x30] %vm3_vm0, %v2_v2   ;;  %7 = vst.msk [vmem:[%s359_s1] ss:$16 sm:$0xc0] %vm3_vm0, %v2_v2  }
   0x5   :  { %139 = vst.msk [vmem:[%s359_s1 + $0x8] ss:$16 sm:$0x3] %vm3_vm0, %v138_v3   ;;  %140 = vst.msk [vmem:[%s359_s1 + $0x8] ss:$16 sm:$0xc] %vm3_vm0, %v138_v3  }
   0x6   :  { %46 = vrot.lane.b32.xlu1 %v150_v1, %s185_s8  ;;  %29 = vrot.lane.b32.xlu0 %v150_v1, %s186_s9  ;;  %141 = vst.msk [vmem:[%s359_s1 + $0x8] ss:$16 sm:$0x30] %vm3_vm0, %v138_v3   ;;  %142 = vst.msk [vmem:[%s359_s1 + $0x8] ss:$16 sm:$0xc0] %vm3_vm0, %v138_v3  }
   0x7   :  { %s189_s4 = smov 48   ;;  %s190_s5 = smov 32  }
   0x8   :  { %s191_s6 = smov 16  }
   0xa   :  { %63 = vrot.lane.b32.xlu1 %v150_v1, %s187_s12  ;;  %54 = vrot.lane.b32.xlu0 %v36_v0, %s187_s12 }
   0xe   :  { %80 = vrot.lane.b32.xlu1 %v150_v1, %s188_s3  ;;  %71 = vrot.lane.b32.xlu0 %v36_v0, %s188_s3 }
  0x12   :  { %97 = vrot.lane.b32.xlu1 %v150_v1, %s189_s4  ;;  %88 = vrot.lane.b32.xlu0 %v36_v0, %s189_s4 }
  0x16   :  { %114 = vrot.lane.b32.xlu1 %v150_v1, %s190_s5  ;;  %105 = vrot.lane.b32.xlu0 %v36_v0, %s190_s5 }
  0x1a   :  { %131 = vrot.lane.b32.xlu1 %v150_v1, %s191_s6  ;;  %122 = vrot.lane.b32.xlu0 %v36_v0, %s191_s6 }
  0x74   :  { %v38_v4 = vpop.permute.xlu1 %37   ;;  %v21_v5 = vpop.permute.xlu0 %20  }
  0x75   :  { %148 = vst.msk [vmem:[%s359_s1 + $0x2] ss:$8 sm:$0xf] %vm3_vm0, %v38_v4   ;;  %149 = vst.msk [vmem:[%s359_s1 + $0x2] ss:$8 sm:$0xf0] %vm3_vm0, %v38_v4  }
  0x76   :  { %143 = vst.msk [vmem:[%s359_s1 + $0x1] ss:$8 sm:$0xf] %vm3_vm0, %v21_v5   ;;  %144 = vst.msk [vmem:[%s359_s1 + $0x1] ss:$8 sm:$0xf0] %vm3_vm0, %v21_v5  }
  0x78   :  { %v47_v6 = vpop.permute.xlu1 %46   ;;  %v30_v7 = vpop.permute.xlu0 %29  }
  0x79   :  { %151 = vst.msk [vmem:[%s359_s1 + $0x42] ss:$8 sm:$0xf] %vm3_vm0, %v47_v6   ;;  %152 = vst.msk [vmem:[%s359_s1 + $0x42] ss:$8 sm:$0xf0] %vm3_vm0, %v47_v6  }
  0x7a   :  { %146 = vst.msk [vmem:[%s359_s1 + $0x41] ss:$8 sm:$0xf] %vm3_vm0, %v30_v7   ;;  %147 = vst.msk [vmem:[%s359_s1 + $0x41] ss:$8 sm:$0xf0] %vm3_vm0, %v30_v7  }
  0x7c   :  { %v64_v8 = vpop.permute.xlu1 %63   ;;  %v55_v9 = vpop.permute.xlu0 %54  }
  0x7d   :  { %156 = vst.msk [vmem:[%s359_s1 + $0x43] ss:$8 sm:$0xf] %vm3_vm0, %v64_v8   ;;  %157 = vst.msk [vmem:[%s359_s1 + $0x43] ss:$8 sm:$0xf0] %vm3_vm0, %v64_v8  }
  0x7e   :  { %153 = vst.msk [vmem:[%s359_s1 + $0x3] ss:$8 sm:$0xf] %vm3_vm0, %v55_v9   ;;  %154 = vst.msk [vmem:[%s359_s1 + $0x3] ss:$8 sm:$0xf0] %vm3_vm0, %v55_v9  }
  0x80   :  { %v81_v10 = vpop.permute.xlu1 %80   ;;  %v72_v11 = vpop.permute.xlu0 %71  }
  0x81   :  { %161 = vst.msk [vmem:[%s359_s1 + $0x44] ss:$8 sm:$0xf] %vm3_vm0, %v81_v10   ;;  %162 = vst.msk [vmem:[%s359_s1 + $0x44] ss:$8 sm:$0xf0] %vm3_vm0, %v81_v10  }
  0x82   :  { %158 = vst.msk [vmem:[%s359_s1 + $0x4] ss:$8 sm:$0xf] %vm3_vm0, %v72_v11   ;;  %159 = vst.msk [vmem:[%s359_s1 + $0x4] ss:$8 sm:$0xf0] %vm3_vm0, %v72_v11  }
  0x84   :  { %v98_v12 = vpop.permute.xlu1 %97   ;;  %v89_v13 = vpop.permute.xlu0 %88  }
  0x85   :  { %166 = vst.msk [vmem:[%s359_s1 + $0x45] ss:$8 sm:$0xf] %vm3_vm0, %v98_v12   ;;  %167 = vst.msk [vmem:[%s359_s1 + $0x45] ss:$8 sm:$0xf0] %vm3_vm0, %v98_v12  }
  0x86   :  { %163 = vst.msk [vmem:[%s359_s1 + $0x5] ss:$8 sm:$0xf] %vm3_vm0, %v89_v13   ;;  %164 = vst.msk [vmem:[%s359_s1 + $0x5] ss:$8 sm:$0xf0] %vm3_vm0, %v89_v13  }
  0x88   :  { %v115_v14 = vpop.permute.xlu1 %114   ;;  %v106_v15 = vpop.permute.xlu0 %105  }
  0x89   :  { %171 = vst.msk [vmem:[%s359_s1 + $0x46] ss:$8 sm:$0xf] %vm3_vm0, %v115_v14   ;;  %172 = vst.msk [vmem:[%s359_s1 + $0x46] ss:$8 sm:$0xf0] %vm3_vm0, %v115_v14  }
  0x8a   :  { %168 = vst.msk [vmem:[%s359_s1 + $0x6] ss:$8 sm:$0xf] %vm3_vm0, %v106_v15   ;;  %169 = vst.msk [vmem:[%s359_s1 + $0x6] ss:$8 sm:$0xf0] %vm3_vm0, %v106_v15  }
  0x8c   :  { %v132_v16 = vpop.permute.xlu1 %131   ;;  %v123_v17 = vpop.permute.xlu0 %122  }
  0x8d   :  { %176 = vst.msk [vmem:[%s359_s1 + $0x47] ss:$8 sm:$0xf] %vm3_vm0, %v132_v16   ;;  %177 = vst.msk [vmem:[%s359_s1 + $0x47] ss:$8 sm:$0xf0] %vm3_vm0, %v132_v16  }
  0x8e   :  { %173 = vst.msk [vmem:[%s359_s1 + $0x7] ss:$8 sm:$0xf] %vm3_vm0, %v123_v17   ;;  %174 = vst.msk [vmem:[%s359_s1 + $0x7] ss:$8 sm:$0xf0] %vm3_vm0, %v123_v17  }

// kernel: squeeze.81
= control target key start
LH: loop header
LB: loop body
LE: loop exit
PB: predicated region body
PF: predicated region fallthrough
CT: control target
= control target key end

     0   :  { %s189_s8 = smov 96   ;;  %s190_s9 = smov 112   ;;  %s267_s0 = inlined_call_operand.vmem [shape: f32[1,8,256], index: 0, kind: input, shape index: {}]   ;;  %s268_s1 = inlined_call_operand.hbm [shape: f32[2,4,16,16], index: 1, kind: output, shape index: {}]  }
   0x1   :  { %v37_v0 = vld.sshfl [vmem:[%s267_s0] sm:$0xff pattern:$0xb3a29180]   ;;  %v151_v1 = vld.sshfl [vmem:[%s267_s0 + $0x4] sm:$0xff pattern:$0xb3a29180]  }
   0x2   :  { %38 = vrot.lane.b32.xlu1 %v37_v0, %s189_s8  ;;  %21 = vrot.lane.b32.xlu0 %v37_v0, %s190_s9 }
   0x3   :  { %2 = vsyncpa [#allocation1], 0  ;;  %s191_s12 = smov 80   ;;  %vm4_vm0 = vcmask 130048   ;;  %v3_v2 = vld [vmem:[%s267_s0] sm:$0xff]   ;;  %v149_v3 = vld [vmem:[%s267_s0 + $0x8] sm:$0xff]  }
   0x4   :  { %5 = vst.msk [vmem:[#allocation0] ss:$16 sm:$0x3] %vm4_vm0, %v3_v2   ;;  %6 = vst.msk [vmem:[#allocation0] ss:$16 sm:$0xc] %vm4_vm0, %v3_v2  }
   0x5   :  { %7 = vst.msk [vmem:[#allocation0] ss:$16 sm:$0x30] %vm4_vm0, %v3_v2   ;;  %8 = vst.msk [vmem:[#allocation0] ss:$16 sm:$0xc0] %vm4_vm0, %v3_v2  }
   0x6   :  { %47 = vrot.lane.b32.xlu1 %v151_v1, %s189_s8  ;;  %30 = vrot.lane.b32.xlu0 %v151_v1, %s190_s9  ;;  %13 = vst.msk [vmem:[#allocation0 + $0x8] ss:$16 sm:$0x3] %vm4_vm0, %v149_v3   ;;  %15 = vst.msk [vmem:[#allocation0 + $0x8] ss:$16 sm:$0xc] %vm4_vm0, %v149_v3  }
   0x7   :  { %17 = vst.msk [vmem:[#allocation0 + $0x8] ss:$16 sm:$0x30] %vm4_vm0, %v149_v3   ;;  %19 = vst.msk [vmem:[#allocation0 + $0x8] ss:$16 sm:$0xc0] %vm4_vm0, %v149_v3  }
   0x8   :  { %s192_s0 = smov 64   ;;  %s193_s17 = smov 48  }
   0x9   :  { %s194_s18 = smov 32   ;;  %s195_s19 = smov 16  }
   0xa   :  { %64 = vrot.lane.b32.xlu1 %v151_v1, %s191_s12  ;;  %55 = vrot.lane.b32.xlu0 %v37_v0, %s191_s12  ;;  %s196_s20 = smov [#allocation0]  }
   0xb   :  { %s143_s21 = sshll.u32 %s196_s20, 4  ;;  %s144_s21 = int_to_ptr.vmem [resolvable:$true] %s143_s21 }
   0xc   :  { %s165_s22 = scalar_lea.vmem %s144_s21, 2048  ;;  %p170_p1 = scmp.lt.s32.totalorder %s144_s21, %s144_s21 }
   0xd   :  { %p166_p0 = scmp.ne.s32.totalorder %s144_s21, %s165_s22  ;;  %p171_p2 = scmp.lt.s32.totalorder %s165_s22, %s165_s22 }
   0xe   :  { %81 = vrot.lane.b32.xlu1 %v151_v1, %s192_s0  ;;  %72 = vrot.lane.b32.xlu0 %v37_v0, %s192_s0 }
   0xf   :  { %p172_p3 = por %p171_p2, %p170_p1 }
  0x11   :  { %p173_p4 = pnand %p172_p3, %p166_p0 }
  0x12   :  { %98 = vrot.lane.b32.xlu1 %v151_v1, %s193_s17  ;;  %89 = vrot.lane.b32.xlu0 %v37_v0, %s193_s17 }
  0x16   :  { %115 = vrot.lane.b32.xlu1 %v151_v1, %s194_s18  ;;  %106 = vrot.lane.b32.xlu0 %v37_v0, %s194_s18 }
  0x1a   :  { %132 = vrot.lane.b32.xlu1 %v151_v1, %s195_s19  ;;  %123 = vrot.lane.b32.xlu0 %v37_v0, %s195_s19 }
  0x74   :  { %v39_v4 = vpop.permute.xlu1 %38   ;;  %v22_v5 = vpop.permute.xlu0 %21  }
  0x75   :  { %42 = vst.msk [vmem:[#allocation0 + $0x2] ss:$8 sm:$0xf] %vm4_vm0, %v39_v4   ;;  %44 = vst.msk [vmem:[#allocation0 + $0x2] ss:$8 sm:$0xf0] %vm4_vm0, %v39_v4  }
  0x76   :  { %25 = vst.msk [vmem:[#allocation0 + $0x1] ss:$8 sm:$0xf] %vm4_vm0, %v22_v5   ;;  %27 = vst.msk [vmem:[#allocation0 + $0x1] ss:$8 sm:$0xf0] %vm4_vm0, %v22_v5  }
  0x78   :  { %v48_v6 = vpop.permute.xlu1 %47   ;;  %v31_v7 = vpop.permute.xlu0 %30  }
  0x79   :  { %51 = vst.msk [vmem:[#allocation0 + $0x42] ss:$8 sm:$0xf] %vm4_vm0, %v48_v6   ;;  %53 = vst.msk [vmem:[#allocation0 + $0x42] ss:$8 sm:$0xf0] %vm4_vm0, %v48_v6  }
  0x7a   :  { %34 = vst.msk [vmem:[#allocation0 + $0x41] ss:$8 sm:$0xf] %vm4_vm0, %v31_v7   ;;  %36 = vst.msk [vmem:[#allocation0 + $0x41] ss:$8 sm:$0xf0] %vm4_vm0, %v31_v7  }
  0x7c   :  { %v65_v8 = vpop.permute.xlu1 %64   ;;  %v56_v9 = vpop.permute.xlu0 %55  }
  0x7d   :  { %68 = vst.msk [vmem:[#allocation0 + $0x43] ss:$8 sm:$0xf] %vm4_vm0, %v65_v8   ;;  %70 = vst.msk [vmem:[#allocation0 + $0x43] ss:$8 sm:$0xf0] %vm4_vm0, %v65_v8  }
  0x7e   :  { %59 = vst.msk [vmem:[#allocation0 + $0x3] ss:$8 sm:$0xf] %vm4_vm0, %v56_v9   ;;  %61 = vst.msk [vmem:[#allocation0 + $0x3] ss:$8 sm:$0xf0] %vm4_vm0, %v56_v9  }
  0x80   :  { %v82_v10 = vpop.permute.xlu1 %81   ;;  %v73_v11 = vpop.permute.xlu0 %72  }
  0x81   :  { %85 = vst.msk [vmem:[#allocation0 + $0x44] ss:$8 sm:$0xf] %vm4_vm0, %v82_v10   ;;  %87 = vst.msk [vmem:[#allocation0 + $0x44] ss:$8 sm:$0xf0] %vm4_vm0, %v82_v10  }
  0x82   :  { %76 = vst.msk [vmem:[#allocation0 + $0x4] ss:$8 sm:$0xf] %vm4_vm0, %v73_v11   ;;  %78 = vst.msk [vmem:[#allocation0 + $0x4] ss:$8 sm:$0xf0] %vm4_vm0, %v73_v11  }
  0x84   :  { %v99_v12 = vpop.permute.xlu1 %98   ;;  %v90_v13 = vpop.permute.xlu0 %89  }
  0x85   :  { %102 = vst.msk [vmem:[#allocation0 + $0x45] ss:$8 sm:$0xf] %vm4_vm0, %v99_v12   ;;  %104 = vst.msk [vmem:[#allocation0 + $0x45] ss:$8 sm:$0xf0] %vm4_vm0, %v99_v12  }
  0x86   :  { %93 = vst.msk [vmem:[#allocation0 + $0x5] ss:$8 sm:$0xf] %vm4_vm0, %v90_v13   ;;  %95 = vst.msk [vmem:[#allocation0 + $0x5] ss:$8 sm:$0xf0] %vm4_vm0, %v90_v13  }
  0x88   :  { %v116_v14 = vpop.permute.xlu1 %115   ;;  %v107_v15 = vpop.permute.xlu0 %106  }
  0x89   :  { %119 = vst.msk [vmem:[#allocation0 + $0x46] ss:$8 sm:$0xf] %vm4_vm0, %v116_v14   ;;  %121 = vst.msk [vmem:[#allocation0 + $0x46] ss:$8 sm:$0xf0] %vm4_vm0, %v116_v14  }
  0x8a   :  { %110 = vst.msk [vmem:[#allocation0 + $0x6] ss:$8 sm:$0xf] %vm4_vm0, %v107_v15   ;;  %112 = vst.msk [vmem:[#allocation0 + $0x6] ss:$8 sm:$0xf0] %vm4_vm0, %v107_v15  }
  0x8c   :  { %v133_v16 = vpop.permute.xlu1 %132   ;;  %v124_v17 = vpop.permute.xlu0 %123  }
  0x8d   :  { %136 = vst.msk [vmem:[#allocation0 + $0x47] ss:$8 sm:$0xf] %vm4_vm0, %v133_v16   ;;  %138 = vst.msk [vmem:[#allocation0 + $0x47] ss:$8 sm:$0xf0] %vm4_vm0, %v133_v16  }
  0x8e   :  { %127 = vst.msk [vmem:[#allocation0 + $0x7] ss:$8 sm:$0xf] %vm4_vm0, %v124_v17   ;;  %129 = vst.msk [vmem:[#allocation0 + $0x7] ss:$8 sm:$0xf0] %vm4_vm0, %v124_v17  }
  0x8f   :  { %176 = shalt.err (!%p173_p4)
}
  0x90   :  { %s177_s25 = scalar_lea.hbm %s268_s1, 2048 }
  0x91   :  { %p178_p5 = scmp.ne.s32.totalorder %s268_s1, %s177_s25  ;;  %p181_p6 = scmp.lt.u32.totalorder %s177_s25, %s268_s1 }
  0x93   :  { %p183_p7 = pnand %p181_p6, %p178_p5 }
  0x95   :  { %186 = shalt.err (!%p183_p7)
}
  0x96   :  { %146 = dma.vmem_to_hbm [thread:$0]  %s144_s21, 2048, %s268_s1, [#allocation1]  }
  0x97   :  { %187 = dma.done.wait [#allocation1], 2048  }
  0x98   :  { %188 = vsyncadd [#allocation1], 4294965248 }
  0x99   :  { %148 = vsyncpa [#allocation1], 1 }

// kernel: forward.3
= control target key start
LH: loop header
LB: loop body
LE: loop exit
PB: predicated region body
PF: predicated region fallthrough
CT: control target
= control target key end

     0   :  { %s1154_s21 = smov 0   ;;  %s1600_s0 = inlined_call_operand.vmem [shape: f32[8,256], index: 0, kind: input, shape index: {}]   ;;  %s1601_s1 = inlined_call_operand.vmem [shape: f32[9,256], index: 1, kind: input, shape index: {}]   ;;  %s1602_s2 = inlined_call_operand.vmem [shape: f32[3,8,72], index: 2, kind: input, shape index: {}]   ;;  %s1603_s3 = inlined_call_operand.vmem [shape: f32[3,8,1], index: 3, kind: input, shape index: {}]   ;;  %s1604_s4 = inlined_call_operand.vmem [shape: f32[3,8,256], index: 4, kind: input, shape index: {}]   ;;  %s1605_s5 = inlined_call_operand.vmem [shape: f32[3,8,256], index: 5, kind: input, shape index: {}]   ;;  %s1606_s6 = inlined_call_operand.vmem [shape: f32[3,32,256], index: 6, kind: output, shape index: {}]  }
   0x1 LB: > { %s975_s22 = sadd.s32 4294967295, %s1106_s21   ;;  %p979_p0 = scmp.ge.s32.totalorder %s1106_s21, 1  ;;  %s1106_s21 = sphi %s1154_s21, %s16_s21  }
   0x2   : > { %p222_p1 = scmp.lt.s32.totalorder %s1106_s21, 4 }
   0x4   : > { %p223_p2 = pnand %p979_p0, %p222_p1 }
   0x5   : > { %p257_p3 = scmp.lt.s32.totalorder (!%p223_p2), %s975_s22, 2  ;;  %p986_p4 = scmp.ne.s32.totalorder (!%p223_p2), %s975_s22, 0 }
   0x6   : > { %226 = sbr.rel (%p223_p2) target bundleno = 1174 (0x496), region = 44 }
   0xd   : > { %s258_s23 = scalar_select %p257_p3, %s975_s22, 2 }
   0xe   : > { %275 = sbr.rel (%p986_p4) target bundleno = 21 (0x15), region = 48  ;;  %v276_v0 = vld [vmem:[%s1600_s0] sm:$0xff] (!%p986_p4)  ;;  %v277_v1 = vld [vmem:[%s1600_s0 + $0x8] sm:$0xff] (!%p986_p4) }
   0xf   : > { %s1000_s24 = sshll.u32 %s258_s23, 4  ;;  %s1002_s25 = sshll.u32 %s258_s23, 6  ;;  %278 = vst [vmem:[#allocation2] sm:$0xff] (!%p986_p4), %v276_v0  ;;  %279 = vst [vmem:[#allocation2 + $0x8] sm:$0xff] (!%p986_p4), %v277_v1 }
  0x10   : > { %s1165_s28 = scalar_lea.vmem %s1604_s4, %s1000_s24  ;;  %s1170_s7 = scalar_lea.vmem %s1605_s5, %s1000_s24 }
  0x11   : > { %s1175_s10 = scalar_lea.vmem %s1606_s6, %s1002_s25 }
  0x15 PF: > { %s1108_s15 = smov 16   ;;  %s1109_s16 = smov 17   ;;  %v1114_v4 = vmov 0.0   ;;  %v1115_v5 = vmov 0   ;;  %v486_v6 = vld [vmem:[%s1603_s3] sm:$0xff]  ;;  %v290_v7 = vlaneseq  ;;  %v1242_v13 = vld [vmem:[%s1601_s1 + $0x8] sm:$0xff] }
  0x16   : > { %v1183_v2 = vld [vmem:[#allocation2] sm:$0xff]  ;;  %v1185_v3 = vld [vmem:[#allocation2 + $0x8] sm:$0xff]  ;;  %s1110_s17 = smov 15   ;;  %s1111_s18 = smov 1   ;;  %560 = vmatprep.mubr.f32.mxu0 %v1114_v4  ;;  %707 = vmatprep.mubr.f32.mxu1 %v1114_v4  ;;  %vm492_vm8 = vcmask 588800  }
  0x17   : > { %305 = vrot.lane.b32.xlu1 %v1183_v2, %s1108_s15  ;;  %900 = vst [vmem:[%s1175_s10] sm:$0xff] %v1183_v2  ;;  %286 = vrot.lane.b32.xlu0 %v1183_v2, %s1109_s16  ;;  %901 = vst [vmem:[%s1175_s10 + $0x8] sm:$0xff] %v1185_v3  ;;  %s1112_s19 = smov 127   ;;  %s1113_s20 = smov 113   ;;  %v1228_v8 = vshrl.u32 %v290_v7, 7  ;;  %v1230_v9 = vand.u32 127, %v290_v7 }
  0x18   : > { %1080 = vset.pattern.permute.xlu0 %v1115_v5  ;;  %1081 = vset.pattern.permute.xlu1 %v1115_v5  ;;  %s1116_s22 = smov 112   ;;  %s1117_s23 = smov 111   ;;  %v1237_v12 = vld [vmem:[%s1601_s1] sm:$0xff] }
  0x19   : > { %v314_v10 = vsub.s32 1, %v1228_v8  ;;  %v297_v11 = vsub.s32 0, %v1228_v8  ;;  %vm309_vm0 = vcmp.lt.s32.totalorder %v1230_v9, 16  ;;  %vm292_vm1 = vcmp.lt.s32.totalorder %v1230_v9, 17 }
  0x1a   : > { %v331_v22 = vsub.s32 2, %v1228_v8  ;;  %v348_v23 = vsub.s32 3, %v1228_v8  ;;  %vm326_vm2 = vcmp.lt.s32.totalorder %v1230_v9, 15  ;;  %vm343_vm3 = vcmp.lt.s32.totalorder %v1230_v9, 1 }
  0x1b   : > { %307 = vrot.lane.b32.xlu1 %v1185_v3, %s1108_s15  ;;  %288 = vrot.lane.b32.xlu0 %v1185_v3, %s1109_s16  ;;  %v1247_v16 = vrot.slane %v1237_v12, %v314_v10  ;;  %v1250_v17 = vrot.slane %v1237_v12, %v297_v11  ;;  %v1253_v18 = vrot.slane %v1242_v13, %v297_v11  ;;  %v365_v36 = vsub.s32 5, %v1228_v8 }
  0x1c   : > { %v1256_v19 = vrot.slane %v1242_v13, %v314_v10  ;;  %v1282_v37 = vrot.slane %v1237_v12, %v331_v22  ;;  %v1285_v38 = vrot.slane %v1242_v13, %v331_v22  ;;  %v1288_v39 = vrot.slane %v1237_v12, %v348_v23 }
  0x1d   : > { %v1291_v40 = vrot.slane %v1242_v13, %v348_v23  ;;  %vm360_vm4 = vcmp.lt.s32.totalorder %v1230_v9, 127  ;;  %v1303_v47 = vrot.slane %v1237_v12, %v365_v36  ;;  %v1306_v48 = vrot.slane %v1242_v13, %v365_v36 }
  0x1e   : > { %v382_v59 = vsub.s32 6, %v1228_v8  ;;  %v399_v62 = vsub.s32 7, %v1228_v8  ;;  %vm377_vm5 = vcmp.lt.s32.totalorder %v1230_v9, 113  ;;  %vm394_vm6 = vcmp.lt.s32.totalorder %v1230_v9, 112 }
  0x1f   : > { %324 = vrot.lane.b32.xlu1 %v1185_v3, %s1110_s17  ;;  %322 = vrot.lane.b32.xlu0 %v1183_v2, %s1110_s17  ;;  %vm411_vm7 = vcmp.lt.s32.totalorder %v1230_v9, 111 }
  0x20   : > { %v1327_v7 = vrot.slane %v1242_v13, %v382_v59  ;;  %v1331_v8 = vrot.slane %v1237_v12, %v399_v62  ;;  %v1334_v10 = vrot.slane %v1242_v13, %v399_v62 }
  0x23   : > { %341 = vrot.lane.b32.xlu1 %v1185_v3, %s1111_s18  ;;  %339 = vrot.lane.b32.xlu0 %v1183_v2, %s1111_s18 }
  0x27   : > { %358 = vrot.lane.b32.xlu1 %v1185_v3, %s1112_s19  ;;  %356 = vrot.lane.b32.xlu0 %v1183_v2, %s1112_s19 }
  0x2b   : > { %375 = vrot.lane.b32.xlu1 %v1185_v3, %s1113_s20  ;;  %373 = vrot.lane.b32.xlu0 %v1183_v2, %s1113_s20 }
  0x2f   : > { %392 = vrot.lane.b32.xlu1 %v1185_v3, %s1116_s22  ;;  %390 = vrot.lane.b32.xlu0 %v1183_v2, %s1116_s22 }
  0x33   : > { %409 = vrot.lane.b32.xlu1 %v1185_v3, %s1117_s23  ;;  %407 = vrot.lane.b32.xlu0 %v1183_v2, %s1117_s23 }
  0x37   : > { %489 = vperm.xlu0 %1080, %v486_v6   ;;  %v1324_v6 = vrot.slane %v1237_v12, %v382_v59 }
  0x89   : > { %v306_v14 = vpop.permute.xlu1 %305  ;;  %v287_v15 = vpop.permute.xlu0 %286 }
  0x8d   : > { %v308_v20 = vpop.permute.xlu1 %307  ;;  %v289_v21 = vpop.permute.xlu0 %288 }
  0x8e   : > { %v310_v24 = vsel %vm309_vm0, %v306_v14, %v308_v20  ;;  %v311_v25 = vsel %vm309_vm0, %v308_v20, %v306_v14  ;;  %v293_v26 = vsel %vm292_vm1, %v287_v15, %v289_v21  ;;  %v294_v27 = vsel %vm292_vm1, %v289_v21, %v287_v15 }
  0x8f   : > { %v1269_v28 = vmul.f32 %v1247_v16, %v311_v25  ;;  %v303_v29 = vmul.f32 %v1250_v17, %v294_v27  ;;  %v304_v30 = vmul.f32 %v1253_v18, %v293_v26  ;;  %v1274_v31 = vmul.f32 %v1256_v19, %v310_v24  ;;  %v1352_v25 = vld [vmem:[%s1601_s1 + $0x18] ss:$0 sm:$0xff] }
  0x91   : > { %v325_v32 = vpop.permute.xlu1 %324  ;;  %v323_v33 = vpop.permute.xlu0 %322  ;;  %v1003_v34 = vpack.c.bf16 %v1274_v31, %v304_v30  ;;  %v1005_v35 = vpack.c.bf16 %v1269_v28, %v303_v29  ;;  %v1357_v29 = vld [vmem:[%s1601_s1 + $0x10] ss:$0 sm:$0xff] }
  0x92   : > { %v327_v41 = vsel %vm326_vm2, %v323_v33, %v325_v32  ;;  %v328_v42 = vsel %vm326_vm2, %v325_v32, %v323_v33 }
  0x93   : > { %1004 = vmatprep.subr.bf16.mxu0 %v1003_v34  ;;  %v337_v49 = vmul.f32 %v1282_v37, %v328_v42  ;;  %v338_v50 = vmul.f32 %v1285_v38, %v327_v41  ;;  %v485_v41 = vld [vmem:[%s1602_s2] sm:$0xff] }
  0x94   : > { %1006 = vmatpush1.bf16.msra.mxu0 %v1005_v35 }
  0x95   : > { %v342_v43 = vpop.permute.xlu1 %341  ;;  %v340_v44 = vpop.permute.xlu0 %339 }
  0x96   : > { %v344_v45 = vsel %vm343_vm3, %v340_v44, %v342_v43  ;;  %v345_v46 = vsel %vm343_vm3, %v342_v43, %v340_v44 }
  0x97   : > { %v354_v51 = vmul.f32 %v1288_v39, %v345_v46  ;;  %v355_v52 = vmul.f32 %v1291_v40, %v344_v45 }
  0x99   : > { %v359_v53 = vpop.permute.xlu1 %358  ;;  %v357_v54 = vpop.permute.xlu0 %356  ;;  %v1007_v55 = vpack.c.bf16 %v355_v52, %v338_v50  ;;  %v1009_v56 = vpack.c.bf16 %v354_v51, %v337_v49  ;;  %v425_v49 = vmul.f32 %v1256_v19, %v1185_v3 }
  0x9a   : > { %v361_v57 = vsel %vm360_vm4, %v357_v54, %v359_v53  ;;  %v362_v58 = vsel %vm360_vm4, %v359_v53, %v357_v54  ;;  %v991_v53 = vld [vmem:[%s1603_s3 + $0x8] sm:$0xff] }
  0x9b   : > { %v371_v60 = vmul.f32 %v1303_v47, %v361_v57  ;;  %v372_v61 = vmul.f32 %v1306_v48, %v362_v58  ;;  %1008 = vmatprep.subr.bf16.mxu0 %v1007_v55  ;;  %v1418_v51 = vsub.f32 %v425_v49, %v1274_v31 }
  0x9c   : > { %1010 = vmatpush1.bf16.msra.mxu0 %v1009_v56 }
  0x9d   : > { %v376_v63 = vpop.permute.xlu1 %375  ;;  %v374_v0 = vpop.permute.xlu0 %373  ;;  %v1011_v1 = vpack.c.bf16 %v372_v61, %v1185_v3  ;;  %v1013_v5 = vpack.c.bf16 %v371_v60, %v1183_v2 }
  0x9e   : > { %v378_v11 = vsel %vm377_vm5, %v374_v0, %v376_v63  ;;  %v379_v14 = vsel %vm377_vm5, %v376_v63, %v374_v0 }
  0x9f   : > { %1012 = vmatprep.subr.bf16.mxu0 %v1011_v1  ;;  %v388_v12 = vmul.f32 %v1324_v6, %v378_v11  ;;  %v389_v13 = vmul.f32 %v1327_v7, %v379_v14 }
  0xa0   : > { %1014 = vmatpush1.bf16.msra.mxu0 %v1013_v5 }
  0xa1   : > { %v393_v15 = vpop.permute.xlu1 %392  ;;  %v391_v20 = vpop.permute.xlu0 %390 }
  0xa2   : > { %v395_v21 = vsel %vm394_vm6, %v391_v20, %v393_v15  ;;  %v396_v22 = vsel %vm394_vm6, %v393_v15, %v391_v20 }
  0xa3   : > { %v405_v23 = vmul.f32 %v1331_v8, %v395_v21  ;;  %v406_v24 = vmul.f32 %v1334_v10, %v396_v22 }
  0xa5   : > { %v410_v26 = vpop.permute.xlu1 %409  ;;  %v1015_v27 = vpack.c.bf16 %v406_v24, %v389_v13  ;;  %v408_v30 = vpop.permute.xlu0 %407  ;;  %v1017_v32 = vpack.c.bf16 %v405_v23, %v388_v12 }
  0xa6   : > { %v412_v33 = vsel %vm411_vm7, %v408_v30, %v410_v26  ;;  %v413_v34 = vsel %vm411_vm7, %v410_v26, %v408_v30 }
  0xa7   : > { %1016 = vmatprep.subr.bf16.mxu0 %v1015_v27  ;;  %v423_v35 = vmul.f32 %v1352_v25, %v413_v34  ;;  %v422_v36 = vmul.f32 %v1357_v29, %v412_v33 }
  0xa8   : > { %1018 = vmatpush1.bf16.msra.mxu0 %v1017_v32 }
  0xa9   : > { %512 = vmatprep.subr.mxu0 %v423_v35 }
  0xac   : > { %513 = vmatpush1.msra.mxu0 %v422_v36 }
  0xad   : > { %989 = vmatmul.mubr.msk.f32.vlgmr.msra.gmra.mrb[0].mxu0 %vm492_vm8, %v485_v41 }
  0xae   : > { %874 = vmatprep.mubr.f32.mxu0 %v1114_v4  ;;  %v424_v4 = vmul.f32 %v1247_v16, %v1183_v2 }
  0xb0   : > { %v1415_v50 = vsub.f32 %v424_v4, %v1269_v28 }
  0xb2   : > { %v428_v52 = vadd.f32 %v1418_v51, %v1415_v50 }
  0xb6   : > { %v490_v42 = vpop.permute.xlu0 %489 }
 0x180   : > { %v562_v43 = vpop.f32.mrb[0].mxu0 }
 0x181   : > { %v1370_v44 = vadd.f32 %v562_v43, %v490_v42  ;;  %v564_v45 = vpop.f32.mrb[1].mxu0 }
 0x182   : > { %v1372_v46 = vadd.f32 %v564_v45, %v490_v42 }
 0x183   : > { %902 = vst [vmem:[%s1175_s10 + $0x10] sm:$0xff] %v1370_v44  ;;  %575 = vrot.lane.b32.xlu0 %v1370_v44, %s1108_s15  ;;  %567 = vrot.lane.b32.xlu1 %v1370_v44, %s1109_s16 }
 0x184   : > { %903 = vst [vmem:[%s1175_s10 + $0x18] sm:$0xff] %v1372_v46 }
 0x187   : > { %583 = vrot.lane.b32.xlu0 %v1370_v44, %s1110_s17  ;;  %569 = vrot.lane.b32.xlu1 %v1372_v46, %s1109_s16 }
 0x18b   : > { %591 = vrot.lane.b32.xlu0 %v1370_v44, %s1111_s18  ;;  %577 = vrot.lane.b32.xlu1 %v1372_v46, %s1108_s15 }
 0x18f   : > { %599 = vrot.lane.b32.xlu0 %v1370_v44, %s1112_s19  ;;  %585 = vrot.lane.b32.xlu1 %v1372_v46, %s1110_s17 }
 0x193   : > { %607 = vrot.lane.b32.xlu0 %v1370_v44, %s1113_s20  ;;  %593 = vrot.lane.b32.xlu1 %v1372_v46, %s1111_s18 }
 0x197   : > { %615 = vrot.lane.b32.xlu0 %v1370_v44, %s1116_s22  ;;  %601 = vrot.lane.b32.xlu1 %v1372_v46, %s1112_s19 }
 0x19b   : > { %623 = vrot.lane.b32.xlu0 %v1370_v44, %s1117_s23  ;;  %609 = vrot.lane.b32.xlu1 %v1372_v46, %s1113_s20 }
 0x19f   : > { %617 = vrot.lane.b32.xlu1 %v1372_v46, %s1116_s22 }
 0x1a3   : > { %625 = vrot.lane.b32.xlu1 %v1372_v46, %s1117_s23 }
 0x1a7   : > { %637 = vperm.xlu1 %1081, %v991_v53  }
 0x1ba   : > { %429 = vadd.xlane.f32.xlu0 %v428_v52 }
 0x1f5   : > { %v576_v54 = vpop.permute.xlu0 %575  ;;  %v568_v55 = vpop.permute.xlu1 %567 }
 0x1f9   : > { %v584_v56 = vpop.permute.xlu0 %583  ;;  %v570_v57 = vpop.permute.xlu1 %569 }
 0x1fa   : > { %v571_v28 = vsel %vm292_vm1, %v568_v55, %v570_v57  ;;  %v572_v31 = vsel %vm292_vm1, %v570_v57, %v568_v55 }
 0x1fb   : > { %v573_v62 = vmul.f32 %v572_v31, %v1250_v17  ;;  %v574_v0 = vmul.f32 %v571_v28, %v1253_v18 }
 0x1fd   : > { %v592_v58 = vpop.permute.xlu0 %591  ;;  %v578_v59 = vpop.permute.xlu1 %577 }
 0x1fe   : > { %v579_v60 = vsel %vm309_vm0, %v576_v54, %v578_v59  ;;  %v580_v61 = vsel %vm309_vm0, %v578_v59, %v576_v54 }
 0x1ff   : > { %v581_v63 = vmul.f32 %v580_v61, %v1247_v16  ;;  %v582_v1 = vmul.f32 %v579_v60, %v1256_v19 }
 0x201   : > { %v586_v5 = vpop.permute.xlu1 %585  ;;  %v1019_v11 = vpack.c.bf16 %v582_v1, %v574_v0  ;;  %v1021_v14 = vpack.c.bf16 %v581_v63, %v573_v62  ;;  %v600_v15 = vpop.permute.xlu0 %599 }
 0x202   : > { %v587_v20 = vsel %vm326_vm2, %v584_v56, %v586_v5  ;;  %v588_v21 = vsel %vm326_vm2, %v586_v5, %v584_v56 }
 0x203   : > { %1020 = vmatprep.subr.bf16.mxu1 %v1019_v11  ;;  %v589_v23 = vmul.f32 %v588_v21, %v1282_v37  ;;  %v590_v24 = vmul.f32 %v587_v20, %v1285_v38  ;;  %v990_v11 = vld [vmem:[%s1602_s2 + $0x8] sm:$0xff] }
 0x204   : > { %1022 = vmatpush1.bf16.msra.mxu1 %v1021_v14 }
 0x205   : > { %v594_v22 = vpop.permute.xlu1 %593  ;;  %v608_v30 = vpop.permute.xlu0 %607 }
 0x206   : > { %v595_v12 = vsel %vm343_vm3, %v592_v58, %v594_v22  ;;  %v596_v13 = vsel %vm343_vm3, %v594_v22, %v592_v58 }
 0x207   : > { %v597_v26 = vmul.f32 %v596_v13, %v1288_v39  ;;  %v598_v27 = vmul.f32 %v595_v12, %v1291_v40 }
 0x209   : > { %v602_v32 = vpop.permute.xlu1 %601  ;;  %v1023_v33 = vpack.c.bf16 %v598_v27, %v590_v24  ;;  %v1025_v34 = vpack.c.bf16 %v597_v26, %v589_v23  ;;  %v616_v49 = vpop.permute.xlu0 %615 }
 0x20a   : > { %v603_v35 = vsel %vm360_vm4, %v600_v15, %v602_v32  ;;  %v604_v36 = vsel %vm360_vm4, %v602_v32, %v600_v15 }
 0x20b   : > { %v605_v41 = vmul.f32 %v603_v35, %v1303_v47  ;;  %v606_v42 = vmul.f32 %v604_v36, %v1306_v48  ;;  %1024 = vmatprep.subr.bf16.mxu1 %v1023_v33 }
 0x20c   : > { %1026 = vmatpush1.bf16.msra.mxu1 %v1025_v34 }
 0x20d   : > { %v610_v43 = vpop.permute.xlu1 %609  ;;  %v1027_v45 = vpack.c.bf16 %v606_v42, %v1372_v46  ;;  %v1029_v4 = vpack.c.bf16 %v605_v41, %v1370_v44  ;;  %v624_v59 = vpop.permute.xlu0 %623 }
 0x20e   : > { %v611_v52 = vsel %vm377_vm5, %v608_v30, %v610_v43  ;;  %v612_v53 = vsel %vm377_vm5, %v610_v43, %v608_v30 }
 0x20f   : > { %1028 = vmatprep.subr.bf16.mxu1 %v1027_v45  ;;  %v613_v57 = vmul.f32 %v611_v52, %v1324_v6  ;;  %v614_v28 = vmul.f32 %v612_v53, %v1327_v7 }
 0x210   : > { %1030 = vmatpush1.bf16.msra.mxu1 %v1029_v4 }
 0x211   : > { %v618_v54 = vpop.permute.xlu1 %617 }
 0x212   : > { %v619_v55 = vsel %vm394_vm6, %v616_v49, %v618_v54  ;;  %v620_v56 = vsel %vm394_vm6, %v618_v54, %v616_v49 }
 0x213   : > { %v621_v31 = vmul.f32 %v619_v55, %v1331_v8  ;;  %v622_v58 = vmul.f32 %v620_v56, %v1334_v10 }
 0x215   : > { %v626_v60 = vpop.permute.xlu1 %625  ;;  %v1031_v61 = vpack.c.bf16 %v622_v58, %v614_v28  ;;  %v1033_v62 = vpack.c.bf16 %v621_v31, %v613_v57 }
 0x216   : > { %v628_v63 = vsel %vm411_vm7, %v626_v60, %v624_v59  ;;  %v627_v0 = vsel %vm411_vm7, %v624_v59, %v626_v60 }
 0x217   : > { %v630_v1 = vmul.f32 %v1352_v25, %v628_v63  ;;  %1032 = vmatprep.subr.bf16.mxu1 %v1031_v61  ;;  %v629_v5 = vmul.f32 %v1357_v29, %v627_v0 }
 0x218   : > { %1034 = vmatpush1.bf16.msra.mxu1 %v1033_v62 }
 0x219   : > { %659 = vmatprep.subr.mxu1 %v630_v1 }
 0x21c   : > { %660 = vmatpush1.msra.mxu1 %v629_v5  ;;  %v996_v5 = vld [vmem:[%s1603_s3 + $0x10] sm:$0xff] }
 0x21d   : > { %992 = vmatmul.mubr.msk.f32.vlgmr.msra.gmra.mrb[0].mxu1 %vm492_vm8, %v990_v11 }
 0x226   : > { %v638_v35 = vpop.permute.xlu1 %637 }
 0x247   : > { %v430_v14 = vpop.xlane.xlu0 %429 }
 0x248   : > { %v431_v15 = vrot.slane %v430_v14, 4 }
 0x24a   : > { %v432_v20 = vadd.f32 %v431_v15, %v430_v14 }
 0x24c   : > { %v433_v21 = vrot.slane %v432_v20, 2 }
 0x24e   : > { %v434_v22 = vadd.f32 %v433_v21, %v432_v20 }
 0x250   : > { %v435_v12 = vrot.slane %v434_v22, 1 }
 0x252   : > { %v436_v13 = vadd.f32 %v435_v12, %v434_v22 }
 0x254   : > { %1051 = vpush %v436_v13 }
 0x285   : > { %s1052_s29 = spop %1051 }
 0x286   : > { %s440_s30 = smul.f32 0.00052083336, %s1052_s29 }
 0x288   : > { %v441_v23 = vstv %s440_s30 }
 0x289   : > { %v442_v24 = vsub.f32 %v1415_v50, %v441_v23  ;;  %v443_v26 = vsub.f32 %v1418_v51, %v441_v23 }
 0x28b   : > { %v444_v27 = vand.u32 2147483647, %v442_v24  ;;  %v445_v30 = vand.u32 2147483647, %v443_v26 }
 0x28d   : > { %v446_v32 = vmul.f32 %v444_v27, %v1247_v16  ;;  %v447_v33 = vmul.f32 %v445_v30, %v1256_v19 }
 0x28f   : > { %v448_v34 = vadd.f32 %v447_v33, %v446_v32 }
 0x291   : > { %449 = vadd.xlane.f32.xlu1 %v448_v34 }
 0x2f0   : > { %v709_v36 = vpop.f32.mrb[0].mxu1 }
 0x2f1   : > { %v710_v41 = vadd.f32 %v709_v36, %v638_v35  ;;  %v711_v42 = vpop.f32.mrb[1].mxu1 }
 0x2f2   : > { %v712_v43 = vadd.f32 %v711_v42, %v638_v35 }
 0x2f3   : > { %v993_v45 = vmul.f32 -1.442695, %v710_v41 }
 0x2f4   : > { %v994_v4 = vmul.f32 -1.442695, %v712_v43 }
 0x2f5   : > { %1082 = vpow2.f32 %v993_v45 }
 0x2f6   : > { %1084 = vpow2.f32 %v994_v4 }
 0x2ff   : > { %v1083_v50 = vpop.eup %1082 }
 0x300   : > { %v1085_v51 = vpop.eup %1084  ;;  %v720_v49 = vadd.f32 1.0, %v1083_v50 }
 0x301   : > { %v721_v52 = vadd.f32 1.0, %v1085_v51 }
 0x302   : > { %1086 = vrcp.f32 %v720_v49 }
 0x303   : > { %1088 = vrcp.f32 %v721_v52 }
 0x30c   : > { %v1087_v53 = vpop.eup %1086 }
 0x30d   : > { %v1089_v54 = vpop.eup %1088  ;;  %1090 = vrcp.f32 %v1087_v53  ;;  %904 = vst [vmem:[%s1175_s10 + $0x20] sm:$0xff] %v1087_v53 }
 0x30e   : > { %1092 = vrcp.f32 %v1089_v54  ;;  %905 = vst [vmem:[%s1175_s10 + $0x28] sm:$0xff] %v1089_v54 }
 0x317   : > { %v1091_v55 = vpop.eup %1090 }
 0x318   : > { %v1093_v56 = vpop.eup %1092  ;;  %v727_v57 = vmul.f32 %v1091_v55, %v1370_v44 }
 0x319   : > { %v729_v28 = vmul.f32 %v1093_v56, %v1372_v46 }
 0x31a   : > { %v730_v31 = vmax.f32 %v727_v57, 0.0 }
 0x31b   : > { %v731_v58 = vmax.f32 %v729_v28, 0.0 }
 0x31c   : > { %v1487_v59 = vmin.f32 %v730_v31, 1.0 }
 0x31d   : > { %v1489_v60 = vmin.f32 %v731_v58, 1.0 }
 0x31e   : > { %906 = vst [vmem:[%s1175_s10 + $0x30] sm:$0xff] %v1487_v59  ;;  %734 = vrot.lane.b32.xlu0 %v1487_v59, %s1109_s16  ;;  %750 = vrot.lane.b32.xlu1 %v1487_v59, %s1110_s17  ;;  %v450_v61 = vpop.xlane.xlu1 %449 }
 0x31f   : > { %907 = vst [vmem:[%s1175_s10 + $0x38] sm:$0xff] %v1489_v60  ;;  %v451_v44 = vrot.slane %v450_v61, 4 }
 0x321   : > { %v452_v62 = vadd.f32 %v451_v44, %v450_v61 }
 0x322   : > { %742 = vrot.lane.b32.xlu0 %v1487_v59, %s1108_s15  ;;  %758 = vrot.lane.b32.xlu1 %v1487_v59, %s1111_s18 }
 0x323   : > { %v453_v46 = vrot.slane %v452_v62, 2 }
 0x325   : > { %v454_v63 = vadd.f32 %v453_v46, %v452_v62 }
 0x326   : > { %744 = vrot.lane.b32.xlu0 %v1489_v60, %s1108_s15  ;;  %736 = vrot.lane.b32.xlu1 %v1489_v60, %s1109_s16 }
 0x327   : > { %v455_v0 = vrot.slane %v454_v63, 1 }
 0x329   : > { %v456_v1 = vadd.f32 %v455_v0, %v454_v63 }
 0x32a   : > { %752 = vrot.lane.b32.xlu0 %v1489_v60, %s1110_s17  ;;  %766 = vrot.lane.b32.xlu1 %v1487_v59, %s1112_s19 }
 0x32b   : > { %1053 = vpush %v456_v1 }
 0x32e   : > { %760 = vrot.lane.b32.xlu0 %v1489_v60, %s1111_s18  ;;  %774 = vrot.lane.b32.xlu1 %v1487_v59, %s1113_s20 }
 0x332   : > { %768 = vrot.lane.b32.xlu0 %v1489_v60, %s1112_s19  ;;  %782 = vrot.lane.b32.xlu1 %v1487_v59, %s1116_s22 }
 0x336   : > { %776 = vrot.lane.b32.xlu0 %v1489_v60, %s1113_s20  ;;  %790 = vrot.lane.b32.xlu1 %v1487_v59, %s1117_s23  ;;  %s1118_s20 = smov 1e-30  }
 0x33a   : > { %784 = vrot.lane.b32.xlu0 %v1489_v60, %s1116_s22  ;;  %804 = vperm.xlu1 %1081, %v996_v5  }
 0x33e   : > { %792 = vrot.lane.b32.xlu0 %v1489_v60, %s1117_s23 }
 0x35c   : > { %s1054_s16 = spop %1053 }
 0x35d   : > { %s460_s17 = smul.f32 0.00052083336, %s1054_s16 }
 0x35f   : > { %s1530_s18 = sand.u32 2147483647, %s460_s17 }
 0x360   : > { %s462_s19 = smul.f32 2.5066283, %s1530_s18 }
 0x362   : > { %s464_s8 = smax.f32 %s1118_s20, %s462_s19  ;;  %p463_p5 = scmp.gt.f32.partialorder %s462_s19, 0.0 }
 0x363   : > { %v465_v11 = vstv %s464_s8 }
 0x364   : > { %1094 = vlog2.f32 %v465_v11 }
 0x36e   : > { %v1095_v14 = vpop.eup %1094 }
 0x36f   : > { %v467_v15 = vmul.f32 0.6931472, %v1095_v14 }
 0x371   : > { %1055 = vpush %v467_v15 }
 0x390   : > { %v751_v20 = vpop.permute.xlu1 %750  ;;  %v735_v21 = vpop.permute.xlu0 %734 }
 0x394   : > { %v759_v22 = vpop.permute.xlu1 %758  ;;  %v743_v12 = vpop.permute.xlu0 %742 }
 0x398   : > { %v737_v13 = vpop.permute.xlu1 %736  ;;  %v745_v23 = vpop.permute.xlu0 %744 }
 0x399   : > { %v738_v24 = vsel %vm292_vm1, %v735_v21, %v737_v13  ;;  %v739_v26 = vsel %vm292_vm1, %v737_v13, %v735_v21  ;;  %v746_v27 = vsel %vm309_vm0, %v743_v12, %v745_v23  ;;  %v747_v30 = vsel %vm309_vm0, %v745_v23, %v743_v12  ;;  %v881_v13 = vld [vmem:[%s1165_s28] sm:$0xff] }
 0x39a   : > { %v740_v32 = vmul.f32 %v739_v26, %v1250_v17  ;;  %v741_v33 = vmul.f32 %v738_v24, %v1253_v18  ;;  %v748_v34 = vmul.f32 %v747_v30, %v1247_v16  ;;  %v749_v35 = vmul.f32 %v746_v27, %v1256_v19  ;;  %v888_v24 = vld [vmem:[%s1170_s7] sm:$0xff]  ;;  %v882_v26 = vld [vmem:[%s1165_s28 + $0x8] sm:$0xff] }
 0x39b   : > { %v889_v27 = vld [vmem:[%s1170_s7 + $0x8] sm:$0xff] }
 0x39c   : > { %v1037_v36 = vpack.c.bf16 %v748_v34, %v740_v32  ;;  %v753_v41 = vpop.permute.xlu0 %752  ;;  %v1035_v42 = vpack.c.bf16 %v749_v35, %v741_v33  ;;  %v767_v43 = vpop.permute.xlu1 %766  ;;  %v892_v35 = vsub.f32 1.0, %v888_v24 }
 0x39d   : > { %v754_v45 = vsel %vm326_vm2, %v751_v20, %v753_v41  ;;  %v755_v4 = vsel %vm326_vm2, %v753_v41, %v751_v20 }
 0x39e   : > { %1036 = vmatprep.subr.bf16.mxu0 %v1035_v42  ;;  %v756_v18 = vmul.f32 %v755_v4, %v1282_v37  ;;  %v757_v19 = vmul.f32 %v754_v45, %v1285_v38  ;;  %v890_v4 = vmul.f32 %v888_v24, %v1183_v2 }
 0x39f   : > { %1038 = vmatpush1.bf16.msra.mxu0 %v1037_v36 }
 0x3a0   : > { %v761_v50 = vpop.permute.xlu0 %760  ;;  %v775_v52 = vpop.permute.xlu1 %774 }
 0x3a1   : > { %v762_v17 = vsel %vm343_vm3, %v759_v22, %v761_v50  ;;  %v763_v16 = vsel %vm343_vm3, %v761_v50, %v759_v22 }
 0x3a2   : > { %v764_v51 = vmul.f32 %v763_v16, %v1288_v39  ;;  %v765_v49 = vmul.f32 %v762_v17, %v1291_v40  ;;  %s1056_s22 = spop %1055  ;;  %v891_v17 = vmul.f32 %v889_v27, %v1185_v3 }
 0x3a3   : > { %s469_s23 = smul.f32 0.6666667, %s1056_s22 }
 0x3a4   : > { %v1041_v53 = vpack.c.bf16 %v764_v51, %v756_v18  ;;  %v769_v54 = vpop.permute.xlu0 %768  ;;  %v1039_v55 = vpack.c.bf16 %v765_v49, %v757_v19  ;;  %v783_v61 = vpop.permute.xlu1 %782 }
 0x3a5   : > { %v470_v56 = vstv %s469_s23  ;;  %v770_v57 = vsel %vm360_vm4, %v767_v43, %v769_v54  ;;  %v771_v28 = vsel %vm360_vm4, %v769_v54, %v767_v43  ;;  %v893_v43 = vsub.f32 1.0, %v889_v27 }
 0x3a6   : > { %v471_v37 = vmul.f32 1.442695, %v470_v56  ;;  %v772_v38 = vmul.f32 %v770_v57, %v1303_v47  ;;  %v773_v39 = vmul.f32 %v771_v28, %v1306_v48  ;;  %1040 = vmatprep.subr.bf16.mxu0 %v1039_v55 }
 0x3a7   : > { %1042 = vmatpush1.bf16.msra.mxu0 %v1041_v53 }
 0x3a8   : > { %1096 = vpow2.f32 %v471_v37  ;;  %v1045_v40 = vpack.c.bf16 %v772_v38, %v1487_v59  ;;  %v777_v31 = vpop.permute.xlu0 %776  ;;  %v1043_v58 = vpack.c.bf16 %v773_v39, %v1489_v60  ;;  %v791_v1 = vpop.permute.xlu1 %790 }
 0x3a9   : > { %v778_v44 = vsel %vm377_vm5, %v775_v52, %v777_v31  ;;  %v779_v62 = vsel %vm377_vm5, %v777_v31, %v775_v52 }
 0x3aa   : > { %1044 = vmatprep.subr.bf16.mxu0 %v1043_v58  ;;  %v780_v59 = vmul.f32 %v778_v44, %v1324_v6  ;;  %v781_v60 = vmul.f32 %v779_v62, %v1327_v7 }
 0x3ab   : > { %1046 = vmatpush1.bf16.msra.mxu0 %v1045_v40 }
 0x3ac   : > { %v785_v47 = vpop.permute.xlu0 %784 }
 0x3ad   : > { %v786_v48 = vsel %vm394_vm6, %v783_v61, %v785_v47  ;;  %v787_v46 = vsel %vm394_vm6, %v785_v47, %v783_v61 }
 0x3ae   : > { %v788_v63 = vmul.f32 %v786_v48, %v1331_v8  ;;  %v789_v0 = vmul.f32 %v787_v46, %v1334_v10  ;;  %v995_v8 = vld [vmem:[%s1602_s2 + $0x10] sm:$0xff] }
 0x3b0   : > { %v1049_v5 = vpack.c.bf16 %v788_v63, %v780_v59  ;;  %v793_v11 = vpop.permute.xlu0 %792  ;;  %v1047_v14 = vpack.c.bf16 %v789_v0, %v781_v60 }
 0x3b1   : > { %v795_v15 = vsel %vm411_vm7, %v793_v11, %v791_v1  ;;  %v794_v21 = vsel %vm411_vm7, %v791_v1, %v793_v11 }
 0x3b2   : > { %v1097_v20 = vpop.eup %1096  ;;  %v797_v6 = vmul.f32 %v1352_v25, %v795_v15  ;;  %1048 = vmatprep.subr.bf16.mxu0 %v1047_v14  ;;  %v796_v7 = vmul.f32 %v1357_v29, %v794_v21 }
 0x3b3   : > { %1057 = vpush %v1097_v20  ;;  %1050 = vmatpush1.bf16.msra.mxu0 %v1049_v5 }
 0x3b4   : > { %826 = vmatprep.subr.mxu0 %v797_v6 }
 0x3b7   : > { %827 = vmatpush1.msra.mxu0 %v796_v7 }
 0x3b8   : > { %997 = vmatmul.mubr.msk.f32.vlgmr.msra.gmra.mrb[2].mxu0 %vm492_vm8, %v995_v8 }
 0x3b9   : > { %v805_v30 = vpop.permute.xlu1 %804 }
 0x3e4   : > { %s1058_s12 = spop %1057 }
 0x3e5   : > { %s1608_s12 = smov (!%p463_p5, %s1058_s12), 0.0 }
 0x3e6   : > { %s475_s13 = smul.f32 0.5, %s1608_s12 }
 0x3e8   : > { %v476_v9 = vstv %s475_s13 }
 0x3e9   : > { %1098 = vrsqrt.f32 %v476_v9  ;;  %vm479_vm9 = vcmp.eq.f32.partialorder %v476_v9, inf  ;;  %v482_v29 = vand.u32 2147483648, %v476_v9  ;;  %vm481_vm10 = vcmp.eq.f32.partialorder %v476_v9, 0.0 }
 0x3f3   : > { %v1099_v10 = vpop.eup %1098 }
 0x3f4   : > { %v478_v25 = vmul.f32 %v1099_v10, %v476_v9 }
 0x3f6   : > { %v480_v22 = vsel %vm479_vm9, %v476_v9, %v478_v25 }
 0x3f7   : > { %v483_v12 = vsel %vm481_vm10, %v482_v29, %v480_v22 }
 0x3f8   : > { %1059 = vpush %v483_v12 }
 0x429   : > { %s1060_s14 = spop %1059 }
 0x42a   : > { %v883_v23 = vstv %s1060_s14 }
 0x42b   : > { %v884_v33 = vmul.f32 %v883_v23, %v881_v13  ;;  %v885_v41 = vmul.f32 %v883_v23, %v882_v26 }
 0x48b   : > { %v876_v32 = vpop.f32.mrb[2].mxu0 }
 0x48c   : > { %v877_v34 = vadd.f32 %v876_v32, %v805_v30  ;;  %v878_v36 = vpop.f32.mrb[3].mxu0 }
 0x48d   : > { %v879_v42 = vadd.f32 %v878_v36, %v805_v30 }
 0x48e   : > { %v886_v45 = vadd.f32 %v884_v33, %v877_v34 }
 0x48f   : > { %v887_v50 = vadd.f32 %v885_v41, %v879_v42 }
 0x490   : > { %v894_v16 = vmul.f32 %v892_v35, %v886_v45 }
 0x491   : > { %v895_v18 = vmul.f32 %v893_v43, %v887_v50 }
 0x492   : > { %v896_v19 = vadd.f32 %v894_v16, %v890_v4 }
 0x493   : > { %v897_v51 = vadd.f32 %v895_v18, %v891_v17 }
 0x494   : > { %898 = vst [vmem:[#allocation2] sm:$0xff] %v896_v19 }
 0x495   : > { %899 = vst [vmem:[#allocation2 + $0x8] sm:$0xff] %v897_v51 }
 0x496 PF: > { %s16_s21 = sadd.s32 1, %s1106_s21  }
 0x497   : > { %p13_p6 = scmp.ge.s32.totalorder %s16_s21, 5  }
 0x499   :  { %15 = sbr.rel (!%p13_p6) target bundleno = 1 (0x1), region = 85 }

</bundles_post_ra>
